<compile_context>
chip_gen: v7x
topology: tpu7x:2x2x1
jax: 0.10.0
libtpu: 0.0.40
codegen_flags: <defaults>
</compile_context>

<pallas_src>
import functools
from dataclasses import dataclass

import jax
import jax.numpy as jnp
from jax.experimental import pallas as pl
from jax.experimental.pallas import tpu as pltpu

VMEM_LIMIT = 40 * 1024 * 1024  # fits v7x's 64 MiB/TC with headroom; fine on v5e/v6e


def _pick_tile(dim, tmax):
    """Largest MXU-friendly tile <= tmax that divides dim, else full extent."""
    if dim <= tmax:
        return dim
    for t in (tmax, 1024, 768, 512, 384, 256, 128):
        if t <= tmax and dim % t == 0:
            return t
    return dim  # awkward dim: single full-extent block


# --------------------------------------------------------------------------
# Tiled linear: y = act(x @ w [+ b]) [+ residual], grid (M/tm, N/tn, K/tk)
# f32 VMEM accumulator, init/finalize via pl.when on the (arbitrary) K axis.
# --------------------------------------------------------------------------


def _tiled_linear_kernel(*refs, act, nk, has_bias, has_res):
    x_ref, w_ref, *rest = refs
    pos = 0
    b_ref = rest[pos] if has_bias else None
    pos += 1 if has_bias else 0
    r_ref = rest[pos] if has_res else None
    pos += 1 if has_res else 0
    o_ref, acc_ref = rest[pos], rest[pos + 1]

    k = pl.program_id(2)

    @pl.when(k == 0)
    def _():
        acc_ref[...] = jnp.zeros_like(acc_ref)

    acc_ref[...] += jnp.dot(
        x_ref[...].astype(jnp.bfloat16),   # no-op when x is already bf16
        w_ref[...],
        preferred_element_type=jnp.float32,
    )

    @pl.when(k == nk - 1)
    def _():
        y = acc_ref[...]
        if has_bias:
            y = y + b_ref[...]
        if act == "quick_gelu":
            y = y * jax.nn.sigmoid(1.702 * y)
        if has_res:
            y = y + r_ref[...].astype(jnp.float32)
        o_ref[...] = y.astype(o_ref.dtype)


def tiled_linear(x, w, b=None, res=None, act=None, out_dtype=jnp.float32,
                 tm_max=1024, tn_max=1024, tk_max=512):
    M, K = x.shape
    N = w.shape[1]
    tm = M if M <= tm_max else tm_max          # partial last M block is masked
    tn = _pick_tile(N, tn_max)
    tk = _pick_tile(K, tk_max)
    gm, gn, gk = pl.cdiv(M, tm), N // tn, K // tk

    has_bias = b is not None
    has_res = res is not None
    kern = functools.partial(_tiled_linear_kernel, act=act, nk=gk,
                             has_bias=has_bias, has_res=has_res)

    in_specs = [
        pl.BlockSpec((tm, tk), lambda i, j, k: (i, k)),
        pl.BlockSpec((tk, tn), lambda i, j, k: (k, j)),
    ]
    args = [x, w]
    if has_bias:
        in_specs.append(pl.BlockSpec((1, tn), lambda i, j, k: (0, j)))
        args.append(b)
    if has_res:
        in_specs.append(pl.BlockSpec((tm, tn), lambda i, j, k: (i, j)))
        args.append(res)

    return pl.pallas_call(
        kern,
        out_shape=jax.ShapeDtypeStruct((M, N), out_dtype),
        grid_spec=pltpu.PrefetchScalarGridSpec(
            num_scalar_prefetch=0,
            grid=(gm, gn, gk),
            in_specs=in_specs,
            out_specs=pl.BlockSpec((tm, tn), lambda i, j, k: (i, j)),
            scratch_shapes=[pltpu.VMEM((tm, tn), jnp.float32)],
        ),
        compiler_params=pltpu.CompilerParams(
            dimension_semantics=("parallel", "parallel", "arbitrary"),
            vmem_limit_bytes=VMEM_LIMIT,
        ),
    )(*args)


# --------------------------------------------------------------------------
# Fused LayerNorm + linear: y = act(LN(x) @ w + b), grid (M/tm, N/tn).
# The LayerNorm'd bf16 x tile is computed once per row block (j == 0) into a
# VMEM scratch and reused for every N tile (N axis is "arbitrary").
# --------------------------------------------------------------------------


def _ln_linear_kernel(x_ref, g_ref, beta_ref, w_ref, b_ref, o_ref, xn_ref, *, act, eps):
    @pl.when(pl.program_id(1) == 0)
    def _():
        x = x_ref[...].astype(jnp.float32)
        mean = jnp.mean(x, axis=-1, keepdims=True)
        var = jnp.mean(jnp.square(x - mean), axis=-1, keepdims=True)
        xn = (x - mean) * jax.lax.rsqrt(var + eps)
        xn_ref[...] = (xn * g_ref[...] + beta_ref[...]).astype(jnp.bfloat16)

    y = jnp.dot(xn_ref[...], w_ref[...], preferred_element_type=jnp.float32) + b_ref[...]
    if act == "quick_gelu":
        y = y * jax.nn.sigmoid(1.702 * y)
    o_ref[...] = y.astype(o_ref.dtype)


def ln_linear(x, gamma, beta, w, b, eps, act=None, out_dtype=jnp.bfloat16,
              tm_max=1024, tn_max=1024):
    M, K = x.shape
    N = w.shape[1]
    tm = M if M <= tm_max else tm_max
    tn = _pick_tile(N, tn_max)
    gm, gn = pl.cdiv(M, tm), N // tn

    kern = functools.partial(_ln_linear_kernel, act=act, eps=eps)
    return pl.pallas_call(
        kern,
        out_shape=jax.ShapeDtypeStruct((M, N), out_dtype),
        grid_spec=pltpu.PrefetchScalarGridSpec(
            num_scalar_prefetch=0,
            grid=(gm, gn),
            in_specs=[
                pl.BlockSpec((tm, K), lambda i, j: (i, 0)),
                pl.BlockSpec((1, K), lambda i, j: (0, 0)),
                pl.BlockSpec((1, K), lambda i, j: (0, 0)),
                pl.BlockSpec((K, tn), lambda i, j: (0, j)),
                pl.BlockSpec((1, tn), lambda i, j: (0, j)),
            ],
            out_specs=pl.BlockSpec((tm, tn), lambda i, j: (i, j)),
            scratch_shapes=[pltpu.VMEM((tm, K), jnp.bfloat16)],
        ),
        compiler_params=pltpu.CompilerParams(
            dimension_semantics=("parallel", "arbitrary"),
            vmem_limit_bytes=VMEM_LIMIT,
        ),
    )(x, gamma, beta, w, b)


# --------------------------------------------------------------------------
# Fused embeddings: concat(class, patch) + pos_emb, then pre-LayerNorm.
# Grid over batch; pos table broadcast over batch via index_map.
# --------------------------------------------------------------------------


def _embed_ln_kernel(patch_ref, cls_ref, pos_ref, g_ref, b_ref, o_ref, *, eps):
    emb = jnp.concatenate([cls_ref[...], patch_ref[0]], axis=0) + pos_ref[...]
    mean = jnp.mean(emb, axis=-1, keepdims=True)
    var = jnp.mean(jnp.square(emb - mean), axis=-1, keepdims=True)
    y = (emb - mean) * jax.lax.rsqrt(var + eps)
    o_ref[0] = y * g_ref[...] + b_ref[...]


def embed_pre_ln(patch_embeds, class_emb, pos_emb, gamma, beta, eps):
    B, NP, D = patch_embeds.shape
    S = NP + 1
    kern = functools.partial(_embed_ln_kernel, eps=eps)
    return pl.pallas_call(
        kern,
        out_shape=jax.ShapeDtypeStruct((B, S, D), jnp.float32),
        grid=(B,),
        in_specs=[
            pl.BlockSpec((1, NP, D), lambda b: (b, 0, 0)),
            pl.BlockSpec((1, D), lambda b: (0, 0)),
            pl.BlockSpec((S, D), lambda b: (0, 0)),
            pl.BlockSpec((1, D), lambda b: (0, 0)),
            pl.BlockSpec((1, D), lambda b: (0, 0)),
        ],
        out_specs=pl.BlockSpec((1, S, D), lambda b: (b, 0, 0)),
        compiler_params=pltpu.CompilerParams(
            dimension_semantics=("parallel",), vmem_limit_bytes=VMEM_LIMIT
        ),
    )(patch_embeds, class_emb, pos_emb, gamma, beta)


# --------------------------------------------------------------------------
# Multi-head attention + output projection + residual, fused in one kernel.
# Grid over batch.  The (B, S, 3D) bf16 QKV block index is constant per batch
# so it is DMA'd once; heads are a static unroll whose per-head (S, dh) result
# is immediately pushed through its o_w slice into an (S, D) f32 accumulator
# (initialized with residual + o_b), so no concat and no HBM round-trip of the
# attention output.  Scores contract the head dim via dot_general (no .T).
# --------------------------------------------------------------------------


def _attn_oproj_kernel(qkv_ref, ow_ref, ob_ref, res_ref, o_ref, *, nh, dh):
    D = nh * dh
    acc = res_ref[0] + ob_ref[...]                     # (S, D) f32
    for h in range(nh):                                # static unroll over heads
        # scale already folded into the Q columns of qkv_w / qkv_b at init
        q = qkv_ref[0, :, h * dh:(h + 1) * dh]                       # (S, dh) bf16
        k = qkv_ref[0, :, D + h * dh:D + (h + 1) * dh]
        v = qkv_ref[0, :, 2 * D + h * dh:2 * D + (h + 1) * dh]
        s = jax.lax.dot_general(
            q, k, (((1,), (1,)), ((), ())), preferred_element_type=jnp.float32
        )                                                            # (S, S) f32
        s = s - jnp.max(s, axis=-1, keepdims=True)
        p = jnp.exp(s)
        p = p / jnp.sum(p, axis=-1, keepdims=True)                   # exact softmax
        a = jnp.dot(p.astype(jnp.bfloat16), v, preferred_element_type=jnp.float32)
        acc = acc + jnp.dot(
            a.astype(jnp.bfloat16), ow_ref[h * dh:(h + 1) * dh, :],
            preferred_element_type=jnp.float32,
        )
    o_ref[0] = acc


def attention_oproj(qkv, o_w, o_b, residual, nh, dh):
    B, S, threeD = qkv.shape
    D = nh * dh
    kern = functools.partial(_attn_oproj_kernel, nh=nh, dh=dh)
    return pl.pallas_call(
        kern,
        out_shape=jax.ShapeDtypeStruct((B, S, D), jnp.float32),
        grid=(B,),
        in_specs=[
            pl.BlockSpec((1, S, threeD), lambda b: (b, 0, 0)),
            pl.BlockSpec((D, D), lambda b: (0, 0)),
            pl.BlockSpec((1, D), lambda b: (0, 0)),
            pl.BlockSpec((1, S, D), lambda b: (b, 0, 0)),
        ],
        out_specs=pl.BlockSpec((1, S, D), lambda b: (b, 0, 0)),
        compiler_params=pltpu.CompilerParams(
            dimension_semantics=("parallel",), vmem_limit_bytes=VMEM_LIMIT
        ),
    )(qkv, o_w, o_b, residual)


# ------------------------------- model glue --------------------------------


@dataclass
class Config:
    hidden_size: int = 64
    image_size: int = 16
    patch_size: int = 8
    num_channels: int = 3
    num_attention_heads: int = 4
    intermediate_size: int = 128
    num_hidden_layers: int = 2
    layer_norm_eps: float = 1e-5


def init_params(key, cfg):
    D, C, P = cfg.hidden_size, cfg.num_channels, cfg.patch_size
    I = cfg.intermediate_size
    NP = (cfg.image_size // P) ** 2
    S = NP + 1
    Dh = D // cfg.num_attention_heads
    scale = float(Dh) ** -0.5

    keys = jax.random.split(key, 3 + cfg.num_hidden_layers)

    def dense(k, din, dout):
        return 0.02 * jax.random.normal(k, (din, dout), jnp.float32)

    # PyTorch Conv2d(stride=kernel=P, no bias) weight is (D, C, P, P); as a
    # per-patch matmul it is reshape(D, C*P*P).T.  Flatten/transpose + bf16
    # cast happen ONCE here, not per forward.
    conv_w = 0.02 * jax.random.normal(keys[0], (D, C, P, P), jnp.float32)
    params = {
        "patch_w": conv_w.reshape(D, C * P * P).T.astype(jnp.bfloat16),
        "class_emb": 0.02 * jax.random.normal(keys[1], (D,), jnp.float32),
        "pos_emb": 0.02 * jax.random.normal(keys[2], (S, D), jnp.float32),
        "pre_ln_g": jnp.ones((1, D), jnp.float32),
        "pre_ln_b": jnp.zeros((1, D), jnp.float32),
        "post_ln_g": jnp.ones((1, D), jnp.float32),
        "post_ln_b": jnp.zeros((1, D), jnp.float32),
        "layers": [],
    }
    for l in range(cfg.num_hidden_layers):
        lk = jax.random.split(keys[3 + l], 6)
        # Q/K/V fused column-wise into one (D, 3D) bf16 weight; the 1/sqrt(Dh)
        # attention scale is folded into the Q columns (and would be folded
        # into the Q bias as well -- it is zero here), so the kernel never
        # multiplies by the scale.
        q_w = dense(lk[0], D, D) * scale
        k_w = dense(lk[1], D, D)
        v_w = dense(lk[2], D, D)
        qkv_w = jnp.concatenate([q_w, k_w, v_w], axis=1)
        params["layers"].append({
            "ln1_g": jnp.ones((1, D), jnp.float32), "ln1_b": jnp.zeros((1, D), jnp.float32),
            "ln2_g": jnp.ones((1, D), jnp.float32), "ln2_b": jnp.zeros((1, D), jnp.float32),
            "qkv_w": qkv_w.astype(jnp.bfloat16),
            "qkv_b": jnp.zeros((1, 3 * D), jnp.float32),
            "o_w": dense(lk[3], D, D).astype(jnp.bfloat16),
            "o_b": jnp.zeros((1, D), jnp.float32),
            "fc1_w": dense(lk[4], D, I).astype(jnp.bfloat16),
            "fc1_b": jnp.zeros((1, I), jnp.float32),
            "fc2_w": dense(lk[5], I, D).astype(jnp.bfloat16),
            "fc2_b": jnp.zeros((1, D), jnp.float32),
        })
    return params


def clip_vision_transformer(params, image, cfg):
    B, C, H, W = image.shape
    P = cfg.patch_size
    D = cfg.hidden_size
    Hp, Wp = H // P, W // P
    NP = Hp * Wp
    S = NP + 1
    nh = cfg.num_attention_heads
    Dh = D // nh
    eps = cfg.layer_norm_eps

    # --- CLIPVisionEmbeddings ---
    # Conv2d(stride=kernel=P, no bias) == per-patch flatten + matmul.
    # TODO(synk): stream the patch gather inside the kernel via element index
    # maps instead of this XLA relayout.
    patches = (image.reshape(B, C, Hp, P, Wp, P)
                    .transpose(0, 2, 4, 1, 3, 5)
                    .reshape(B * NP, C * P * P))
    patch_embeds = tiled_linear(patches, params["patch_w"]).reshape(B, NP, D)

    # --- class concat + position embedding + pre_layrnorm (fused) ---
    h = embed_pre_ln(patch_embeds, params["class_emb"][None, :], params["pos_emb"],
                     params["pre_ln_g"], params["pre_ln_b"], eps)
    h = h.reshape(B * S, D)            # residual stream, kept in f32

    # --- CLIPEncoder ---
    for lp in params["layers"]:
        residual = h
        qkv = ln_linear(h, lp["ln1_g"], lp["ln1_b"], lp["qkv_w"], lp["qkv_b"], eps,
                        out_dtype=jnp.bfloat16)                    # (B*S, 3D) bf16
        h = attention_oproj(qkv.reshape(B, S, 3 * D), lp["o_w"], lp["o_b"],
                            residual.reshape(B, S, D), nh, Dh).reshape(B * S, D)

        residual = h
        hm = ln_linear(h, lp["ln2_g"], lp["ln2_b"], lp["fc1_w"], lp["fc1_b"], eps,
                       act="quick_gelu", out_dtype=jnp.bfloat16)   # CLIP quick_gelu
        h = tiled_linear(hm, lp["fc2_w"], lp["fc2_b"], res=residual,
                         out_dtype=jnp.float32)

    # --- pool + post_layernorm (tiny (B, D): plain JAX, no kernel launch) ---
    pooled = h.reshape(B, S, D)[:, 0, :]
    mean = jnp.mean(pooled, axis=-1, keepdims=True)
    var = jnp.mean(jnp.square(pooled - mean), axis=-1, keepdims=True)
    pooled = (pooled - mean) * jax.lax.rsqrt(var + eps)
    return pooled * params["post_ln_g"] + params["post_ln_b"]


if __name__ == "__main__":
    cfg = Config()
    key = jax.random.PRNGKey(0)
    pkey, ikey = jax.random.split(key)
    params = init_params(pkey, cfg)
    image = jax.random.normal(
        ikey, (2, cfg.num_channels, cfg.image_size, cfg.image_size), dtype=jnp.float32
    )
    fwd = jax.jit(lambda p, im: clip_vision_transformer(p, im, cfg))
    out = fwd(params, image)
    out = jax.block_until_ready(out)
    assert out.shape == (2, cfg.hidden_size), out.shape
    assert bool(jnp.all(jnp.isfinite(out)))
    print("KERNEL_OK")
</pallas_src>

<mosaic_0001>
module attributes {stable_mosaic.version = 11 : i64} {
  func.func @_tiled_linear_kernel(%arg0: i32, %arg1: i32, %arg2: i32, %arg3: memref<8x192xf32, #tpu.memory_space<vmem>>, %arg4: memref<192x64xbf16, #tpu.memory_space<vmem>>, %arg5: memref<8x64xf32, #tpu.memory_space<vmem>>, %arg6: memref<8x64xf32, #tpu.memory_space<vmem>>) attributes {dimension_semantics = [#tpu.dimension_semantics<parallel>, #tpu.dimension_semantics<parallel>, #tpu.dimension_semantics<arbitrary>], iteration_bounds = array<i64: 1, 1, 1>, scalar_prefetch = 0 : i64, scratch_operands = 1 : i64, tpu.core_type = #tpu.core_type<tc>, window_params = [{transform_indices = @transform_0, window_bounds = array<i64: 8, 192>}, {transform_indices = @transform_1, window_bounds = array<i64: 192, 64>}, {transform_indices = @transform_2, window_bounds = array<i64: 8, 64>}]} {
    %c0_i32 = arith.constant 0 : i32
    %0 = arith.cmpi eq, %arg2, %c0_i32 : i32
    %1 = arith.extui %0 : i1 to i32
    %c0_i32_0 = arith.constant 0 : i32
    %2 = arith.cmpi ne, %1, %c0_i32_0 : i32
    scf.if %2 {
      %cst_10 = arith.constant 0.000000e+00 : f32
      %13 = vector.broadcast %cst_10 : f32 to vector<8x64xf32>
      %c0_11 = arith.constant 0 : index
      %c0_12 = arith.constant 0 : index
      %14 = vector.load %arg6[%c0_11, %c0_12] : memref<8x64xf32, #tpu.memory_space<vmem>>, vector<8x64xf32>
      tpu.vector_store %arg6[%c0_11, %c0_12], %13 {strides = array<i32>} : memref<8x64xf32, #tpu.memory_space<vmem>>, vector<8x64xf32>,
    } else {
    }
    %c0 = arith.constant 0 : index
    %c0_1 = arith.constant 0 : index
    %3 = vector.load %arg6[%c0, %c0_1] : memref<8x64xf32, #tpu.memory_space<vmem>>, vector<8x64xf32>
    %c0_2 = arith.constant 0 : index
    %c0_3 = arith.constant 0 : index
    %4 = vector.load %arg3[%c0_2, %c0_3] : memref<8x192xf32, #tpu.memory_space<vmem>>, vector<8x192xf32>
    %5 = arith.truncf %4 : vector<8x192xf32> to vector<8x192xbf16>
    %c0_4 = arith.constant 0 : index
    %c0_5 = arith.constant 0 : index
    %6 = vector.load %arg4[%c0_4, %c0_5] : memref<192x64xbf16, #tpu.memory_space<vmem>>, vector<192x64xbf16>
    %cst = arith.constant dense<0.000000e+00> : vector<8x64xf32>
    %7 = tpu.matmul %5, %6, %cst {dimension_numbers = #tpu.dot_dimension_numbers<[1], [0], [0], [1], [0, 0, 1, 1], [], []>} : vector<8x192xbf16>, vector<192x64xbf16>, vector<8x64xf32> -> vector<8x64xf32>
    %8 = arith.addf %3, %7 : vector<8x64xf32>
    %c0_6 = arith.constant 0 : index
    %c0_7 = arith.constant 0 : index
    %9 = vector.load %arg6[%c0_6, %c0_7] : memref<8x64xf32, #tpu.memory_space<vmem>>, vector<8x64xf32>
    tpu.vector_store %arg6[%c0_6, %c0_7], %8 {strides = array<i32>} : memref<8x64xf32, #tpu.memory_space<vmem>>, vector<8x64xf32>,
    %c0_i32_8 = arith.constant 0 : i32
    %10 = arith.cmpi eq, %arg2, %c0_i32_8 : i32
    %11 = arith.extui %10 : i1 to i32
    %c0_i32_9 = arith.constant 0 : i32
    %12 = arith.cmpi ne, %11, %c0_i32_9 : i32
    scf.if %12 {
      %c0_10 = arith.constant 0 : index
      %c0_11 = arith.constant 0 : index
      %13 = vector.load %arg6[%c0_10, %c0_11] : memref<8x64xf32, #tpu.memory_space<vmem>>, vector<8x64xf32>
      %c0_12 = arith.constant 0 : index
      %c0_13 = arith.constant 0 : index
      %14 = vector.load %arg5[%c0_12, %c0_13] : memref<8x64xf32, #tpu.memory_space<vmem>>, vector<8x64xf32>
      tpu.vector_store %arg5[%c0_12, %c0_13], %13 {strides = array<i32>} : memref<8x64xf32, #tpu.memory_space<vmem>>, vector<8x64xf32>,
    } else {
    }
    return
  }
  func.func @transform_0(%arg0: i32, %arg1: i32, %arg2: i32) -> (i32, i32) {
    %c0_i32 = arith.constant 0 : i32
    return %arg0, %arg2 : i32, i32
  }
  func.func @transform_1(%arg0: i32, %arg1: i32, %arg2: i32) -> (i32, i32) {
    %c0_i32 = arith.constant 0 : i32
    return %arg2, %arg1 : i32, i32
  }
  func.func @transform_2(%arg0: i32, %arg1: i32, %arg2: i32) -> (i32, i32) {
    %c0_i32 = arith.constant 0 : i32
    return %arg0, %arg1 : i32, i32
  }
}

module attributes {stable_mosaic.version = 11 : i64} {
  func.func @_embed_ln_kernel(%arg0: i32, %arg1: memref<1x4x64xf32, #tpu.memory_space<vmem>>, %arg2: memref<1x64xf32, #tpu.memory_space<vmem>>, %arg3: memref<5x64xf32, #tpu.memory_space<vmem>>, %arg4: memref<1x64xf32, #tpu.memory_space<vmem>>, %arg5: memref<1x64xf32, #tpu.memory_space<vmem>>, %arg6: memref<1x5x64xf32, #tpu.memory_space<vmem>>) attributes {dimension_semantics = [#tpu.dimension_semantics<parallel>], iteration_bounds = array<i64: 2>, scalar_prefetch = 0 : i64, scratch_operands = 0 : i64, tpu.core_type = #tpu.core_type<tc>, window_params = [{transform_indices = @transform_0, window_bounds = array<i64: 1, 4, 64>}, {pipeline_mode = #tpu.pipeline_mode<synchronous>, transform_indices = @transform_1, window_bounds = array<i64: 1, 64>}, {pipeline_mode = #tpu.pipeline_mode<synchronous>, transform_indices = @transform_2, window_bounds = array<i64: 5, 64>}, {pipeline_mode = #tpu.pipeline_mode<synchronous>, transform_indices = @transform_3, window_bounds = array<i64: 1, 64>}, {pipeline_mode = #tpu.pipeline_mode<synchronous>, transform_indices = @transform_4, window_bounds = array<i64: 1, 64>}, {transform_indices = @transform_5, window_bounds = array<i64: 1, 5, 64>}]} {
    %c0 = arith.constant 0 : index
    %c0_0 = arith.constant 0 : index
    %0 = vector.load %arg2[%c0, %c0_0] : memref<1x64xf32, #tpu.memory_space<vmem>>, vector<1x64xf32>
    %c0_1 = arith.constant 0 : index
    %c0_2 = arith.constant 0 : index
    %c0_3 = arith.constant 0 : index
    %1 = vector.load %arg1[%c0_1, %c0_2, %c0_3] : memref<1x4x64xf32, #tpu.memory_space<vmem>>, vector<1x4x64xf32>
    %2 = vector.shape_cast %1 : vector<1x4x64xf32> to vector<4x64xf32>
    %3 = tpu.concatenate %0, %2 in 0 : vector<1x64xf32>, vector<4x64xf32> -> vector<5x64xf32>
    %c0_4 = arith.constant 0 : index
    %c0_5 = arith.constant 0 : index
    %4 = vector.load %arg3[%c0_4, %c0_5] : memref<5x64xf32, #tpu.memory_space<vmem>>, vector<5x64xf32>
    %5 = arith.addf %3, %4 : vector<5x64xf32>
    %cst = arith.constant dense<0.000000e+00> : vector<5xf32>
    %6 = vector.multi_reduction <add>, %5, %cst [1] : vector<5x64xf32> to vector<5xf32>
    %7 = vector.shape_cast %6 : vector<5xf32> to vector<5x1xf32>
    %cst_6 = arith.constant 6.400000e+01 : f32
    %8 = vector.broadcast %cst_6 : f32 to vector<5x1xf32>
    %9 = arith.divf %7, %8 : vector<5x1xf32>
    %10 = vector.broadcast %9 : vector<5x1xf32> to vector<5x64xf32>
    %11 = arith.subf %5, %10 : vector<5x64xf32>
    %12 = arith.mulf %11, %11 : vector<5x64xf32>
    %cst_7 = arith.constant dense<0.000000e+00> : vector<5xf32>
    %13 = vector.multi_reduction <add>, %12, %cst_7 [1] : vector<5x64xf32> to vector<5xf32>
    %14 = vector.shape_cast %13 : vector<5xf32> to vector<5x1xf32>
    %cst_8 = arith.constant 6.400000e+01 : f32
    %15 = vector.broadcast %cst_8 : f32 to vector<5x1xf32>
    %16 = arith.divf %14, %15 : vector<5x1xf32>
    %17 = vector.broadcast %9 : vector<5x1xf32> to vector<5x64xf32>
    %18 = arith.subf %5, %17 : vector<5x64xf32>
    %cst_9 = arith.constant 9.99999974E-6 : f32
    %19 = vector.broadcast %cst_9 : f32 to vector<5x1xf32>
    %20 = arith.addf %16, %19 : vector<5x1xf32>
    %21 = math.rsqrt %20 : vector<5x1xf32>
    %22 = vector.broadcast %21 : vector<5x1xf32> to vector<5x64xf32>
    %23 = arith.mulf %18, %22 : vector<5x64xf32>
    %c0_10 = arith.constant 0 : index
    %c0_11 = arith.constant 0 : index
    %24 = vector.load %arg4[%c0_10, %c0_11] : memref<1x64xf32, #tpu.memory_space<vmem>>, vector<1x64xf32>
    %25 = vector.broadcast %24 : vector<1x64xf32> to vector<5x64xf32>
    %26 = arith.mulf %23, %25 : vector<5x64xf32>
    %c0_12 = arith.constant 0 : index
    %c0_13 = arith.constant 0 : index
    %27 = vector.load %arg5[%c0_12, %c0_13] : memref<1x64xf32, #tpu.memory_space<vmem>>, vector<1x64xf32>
    %28 = vector.broadcast %27 : vector<1x64xf32> to vector<5x64xf32>
    %29 = arith.addf %26, %28 : vector<5x64xf32>
    %c0_14 = arith.constant 0 : index
    %c0_15 = arith.constant 0 : index
    %c0_16 = arith.constant 0 : index
    %30 = vector.load %arg6[%c0_14, %c0_15, %c0_16] : memref<1x5x64xf32, #tpu.memory_space<vmem>>, vector<1x5x64xf32>
    %31 = vector.shape_cast %30 : vector<1x5x64xf32> to vector<5x64xf32>
    %32 = vector.shape_cast %29 : vector<5x64xf32> to vector<1x5x64xf32>
    tpu.vector_store %arg6[%c0_14, %c0_15, %c0_16], %32 {strides = array<i32>} : memref<1x5x64xf32, #tpu.memory_space<vmem>>, vector<1x5x64xf32>,
    return
  }
  func.func @transform_0(%arg0: i32) -> (i32, i32, i32) {
    %c0_i32 = arith.constant 0 : i32
    %c0_i32_0 = arith.constant 0 : i32
    %c0_i32_1 = arith.constant 0 : i32
    return %arg0, %c0_i32, %c0_i32_0 : i32, i32, i32
  }
  func.func @transform_1(%arg0: i32) -> (i32, i32) {
    %c0_i32 = arith.constant 0 : i32
    %c0_i32_0 = arith.constant 0 : i32
    %c0_i32_1 = arith.constant 0 : i32
    return %c0_i32, %c0_i32_0 : i32, i32
  }
  func.func @transform_2(%arg0: i32) -> (i32, i32) {
    %c0_i32 = arith.constant 0 : i32
    %c0_i32_0 = arith.constant 0 : i32
    %c0_i32_1 = arith.constant 0 : i32
    return %c0_i32, %c0_i32_0 : i32, i32
  }
  func.func @transform_3(%arg0: i32) -> (i32, i32) {
    %c0_i32 = arith.constant 0 : i32
    %c0_i32_0 = arith.constant 0 : i32
    %c0_i32_1 = arith.constant 0 : i32
    return %c0_i32, %c0_i32_0 : i32, i32
  }
  func.func @transform_4(%arg0: i32) -> (i32, i32) {
    %c0_i32 = arith.constant 0 : i32
    %c0_i32_0 = arith.constant 0 : i32
    %c0_i32_1 = arith.constant 0 : i32
    return %c0_i32, %c0_i32_0 : i32, i32
  }
  func.func @transform_5(%arg0: i32) -> (i32, i32, i32) {
    %c0_i32 = arith.constant 0 : i32
    %c0_i32_0 = arith.constant 0 : i32
    %c0_i32_1 = arith.constant 0 : i32
    return %arg0, %c0_i32, %c0_i32_0 : i32, i32, i32
  }
}

module attributes {stable_mosaic.version = 11 : i64} {
  func.func @_ln_linear_kernel(%arg0: i32, %arg1: i32, %arg2: memref<10x64xf32, #tpu.memory_space<vmem>>, %arg3: memref<1x64xf32, #tpu.memory_space<vmem>>, %arg4: memref<1x64xf32, #tpu.memory_space<vmem>>, %arg5: memref<64x192xbf16, #tpu.memory_space<vmem>>, %arg6: memref<1x192xf32, #tpu.memory_space<vmem>>, %arg7: memref<10x192xbf16, #tpu.memory_space<vmem>>, %arg8: memref<10x64xbf16, #tpu.memory_space<vmem>>) attributes {dimension_semantics = [#tpu.dimension_semantics<parallel>, #tpu.dimension_semantics<arbitrary>], iteration_bounds = array<i64: 1, 1>, scalar_prefetch = 0 : i64, scratch_operands = 1 : i64, tpu.core_type = #tpu.core_type<tc>, window_params = [{transform_indices = @transform_0, window_bounds = array<i64: 10, 64>}, {pipeline_mode = #tpu.pipeline_mode<synchronous>, transform_indices = @transform_1, window_bounds = array<i64: 1, 64>}, {pipeline_mode = #tpu.pipeline_mode<synchronous>, transform_indices = @transform_2, window_bounds = array<i64: 1, 64>}, {transform_indices = @transform_3, window_bounds = array<i64: 64, 192>}, {transform_indices = @transform_4, window_bounds = array<i64: 1, 192>}, {transform_indices = @transform_5, window_bounds = array<i64: 10, 192>}]} {
    %c0_i32 = arith.constant 0 : i32
    %0 = arith.cmpi eq, %arg1, %c0_i32 : i32
    %1 = arith.extui %0 : i1 to i32
    %c0_i32_0 = arith.constant 0 : i32
    %2 = arith.cmpi ne, %1, %c0_i32_0 : i32
    scf.if %2 {
      %c0_8 = arith.constant 0 : index
      %c0_9 = arith.constant 0 : index
      %11 = vector.load %arg2[%c0_8, %c0_9] : memref<10x64xf32, #tpu.memory_space<vmem>>, vector<10x64xf32>
      %cst_10 = arith.constant dense<0.000000e+00> : vector<10xf32>
      %12 = vector.multi_reduction <add>, %11, %cst_10 [1] : vector<10x64xf32> to vector<10xf32>
      %13 = vector.shape_cast %12 : vector<10xf32> to vector<10x1xf32>
      %cst_11 = arith.constant 6.400000e+01 : f32
      %14 = vector.broadcast %cst_11 : f32 to vector<10x1xf32>
      %15 = arith.divf %13, %14 : vector<10x1xf32>
      %16 = vector.broadcast %15 : vector<10x1xf32> to vector<10x64xf32>
      %17 = arith.subf %11, %16 : vector<10x64xf32>
      %18 = arith.mulf %17, %17 : vector<10x64xf32>
      %cst_12 = arith.constant dense<0.000000e+00> : vector<10xf32>
      %19 = vector.multi_reduction <add>, %18, %cst_12 [1] : vector<10x64xf32> to vector<10xf32>
      %20 = vector.shape_cast %19 : vector<10xf32> to vector<10x1xf32>
      %cst_13 = arith.constant 6.400000e+01 : f32
      %21 = vector.broadcast %cst_13 : f32 to vector<10x1xf32>
      %22 = arith.divf %20, %21 : vector<10x1xf32>
      %23 = vector.broadcast %15 : vector<10x1xf32> to vector<10x64xf32>
      %24 = arith.subf %11, %23 : vector<10x64xf32>
      %cst_14 = arith.constant 9.99999974E-6 : f32
      %25 = vector.broadcast %cst_14 : f32 to vector<10x1xf32>
      %26 = arith.addf %22, %25 : vector<10x1xf32>
      %27 = math.rsqrt %26 : vector<10x1xf32>
      %28 = vector.broadcast %27 : vector<10x1xf32> to vector<10x64xf32>
      %29 = arith.mulf %24, %28 : vector<10x64xf32>
      %c0_15 = arith.constant 0 : index
      %c0_16 = arith.constant 0 : index
      %30 = vector.load %arg3[%c0_15, %c0_16] : memref<1x64xf32, #tpu.memory_space<vmem>>, vector<1x64xf32>
      %31 = vector.broadcast %30 : vector<1x64xf32> to vector<10x64xf32>
      %32 = arith.mulf %29, %31 : vector<10x64xf32>
      %c0_17 = arith.constant 0 : index
      %c0_18 = arith.constant 0 : index
      %33 = vector.load %arg4[%c0_17, %c0_18] : memref<1x64xf32, #tpu.memory_space<vmem>>, vector<1x64xf32>
      %34 = vector.broadcast %33 : vector<1x64xf32> to vector<10x64xf32>
      %35 = arith.addf %32, %34 : vector<10x64xf32>
      %36 = arith.truncf %35 : vector<10x64xf32> to vector<10x64xbf16>
      %c0_19 = arith.constant 0 : index
      %c0_20 = arith.constant 0 : index
      %37 = vector.load %arg8[%c0_19, %c0_20] : memref<10x64xbf16, #tpu.memory_space<vmem>>, vector<10x64xbf16>
      tpu.vector_store %arg8[%c0_19, %c0_20], %36 {strides = array<i32>} : memref<10x64xbf16, #tpu.memory_space<vmem>>, vector<10x64xbf16>,
    } else {
    }
    %c0 = arith.constant 0 : index
    %c0_1 = arith.constant 0 : index
    %3 = vector.load %arg8[%c0, %c0_1] : memref<10x64xbf16, #tpu.memory_space<vmem>>, vector<10x64xbf16>
    %c0_2 = arith.constant 0 : index
    %c0_3 = arith.constant 0 : index
    %4 = vector.load %arg5[%c0_2, %c0_3] : memref<64x192xbf16, #tpu.memory_space<vmem>>, vector<64x192xbf16>
    %cst = arith.constant dense<0.000000e+00> : vector<10x192xf32>
    %5 = tpu.matmul %3, %4, %cst {dimension_numbers = #tpu.dot_dimension_numbers<[1], [0], [0], [1], [0, 0, 1, 1], [], []>} : vector<10x64xbf16>, vector<64x192xbf16>, vector<10x192xf32> -> vector<10x192xf32>
    %c0_4 = arith.constant 0 : index
    %c0_5 = arith.constant 0 : index
    %6 = vector.load %arg6[%c0_4, %c0_5] : memref<1x192xf32, #tpu.memory_space<vmem>>, vector<1x192xf32>
    %7 = vector.broadcast %6 : vector<1x192xf32> to vector<10x192xf32>
    %8 = arith.addf %5, %7 : vector<10x192xf32>
    %9 = arith.truncf %8 : vector<10x192xf32> to vector<10x192xbf16>
    %c0_6 = arith.constant 0 : index
    %c0_7 = arith.constant 0 : index
    %10 = vector.load %arg7[%c0_6, %c0_7] : memref<10x192xbf16, #tpu.memory_space<vmem>>, vector<10x192xbf16>
    tpu.vector_store %arg7[%c0_6, %c0_7], %9 {strides = array<i32>} : memref<10x192xbf16, #tpu.memory_space<vmem>>, vector<10x192xbf16>,
    return
  }
  func.func @transform_0(%arg0: i32, %arg1: i32) -> (i32, i32) {
    %c0_i32 = arith.constant 0 : i32
    %c0_i32_0 = arith.constant 0 : i32
    return %arg0, %c0_i32 : i32, i32
  }
  func.func @transform_1(%arg0: i32, %arg1: i32) -> (i32, i32) {
    %c0_i32 = arith.constant 0 : i32
    %c0_i32_0 = arith.constant 0 : i32
    %c0_i32_1 = arith.constant 0 : i32
    return %c0_i32, %c0_i32_0 : i32, i32
  }
  func.func @transform_2(%arg0: i32, %arg1: i32) -> (i32, i32) {
    %c0_i32 = arith.constant 0 : i32
    %c0_i32_0 = arith.constant 0 : i32
    %c0_i32_1 = arith.constant 0 : i32
    return %c0_i32, %c0_i32_0 : i32, i32
  }
  func.func @transform_3(%arg0: i32, %arg1: i32) -> (i32, i32) {
    %c0_i32 = arith.constant 0 : i32
    %c0_i32_0 = arith.constant 0 : i32
    return %c0_i32, %arg1 : i32, i32
  }
  func.func @transform_4(%arg0: i32, %arg1: i32) -> (i32, i32) {
    %c0_i32 = arith.constant 0 : i32
    %c0_i32_0 = arith.constant 0 : i32
    return %c0_i32, %arg1 : i32, i32
  }
  func.func @transform_5(%arg0: i32, %arg1: i32) -> (i32, i32) {
    %c0_i32 = arith.constant 0 : i32
    return %arg0, %arg1 : i32, i32
  }
}

module attributes {stable_mosaic.version = 11 : i64} {
  func.func @_attn_oproj_kernel(%arg0: i32, %arg1: memref<1x5x192xbf16, #tpu.memory_space<vmem>>, %arg2: memref<64x64xbf16, #tpu.memory_space<vmem>>, %arg3: memref<1x64xf32, #tpu.memory_space<vmem>>, %arg4: memref<1x5x64xf32, #tpu.memory_space<vmem>>, %arg5: memref<1x5x64xf32, #tpu.memory_space<vmem>>) attributes {dimension_semantics = [#tpu.dimension_semantics<parallel>], iteration_bounds = array<i64: 2>, scalar_prefetch = 0 : i64, scratch_operands = 0 : i64, tpu.core_type = #tpu.core_type<tc>, window_params = [{transform_indices = @transform_0, window_bounds = array<i64: 1, 5, 192>}, {pipeline_mode = #tpu.pipeline_mode<synchronous>, transform_indices = @transform_1, window_bounds = array<i64: 64, 64>}, {pipeline_mode = #tpu.pipeline_mode<synchronous>, transform_indices = @transform_2, window_bounds = array<i64: 1, 64>}, {transform_indices = @transform_3, window_bounds = array<i64: 1, 5, 64>}, {transform_indices = @transform_4, window_bounds = array<i64: 1, 5, 64>}]} {
    %c0 = arith.constant 0 : index
    %c0_0 = arith.constant 0 : index
    %c0_1 = arith.constant 0 : index
    %0 = vector.load %arg4[%c0, %c0_0, %c0_1] : memref<1x5x64xf32, #tpu.memory_space<vmem>>, vector<1x5x64xf32>
    %1 = vector.shape_cast %0 : vector<1x5x64xf32> to vector<5x64xf32>
    %c0_2 = arith.constant 0 : index
    %c0_3 = arith.constant 0 : index
    %2 = vector.load %arg3[%c0_2, %c0_3] : memref<1x64xf32, #tpu.memory_space<vmem>>, vector<1x64xf32>
    %3 = vector.broadcast %2 : vector<1x64xf32> to vector<5x64xf32>
    %4 = arith.addf %1, %3 : vector<5x64xf32>
    %c0_4 = arith.constant 0 : index
    %c0_5 = arith.constant 0 : index
    %c0_6 = arith.constant 0 : index
    %5 = vector.load %arg1[%c0_4, %c0_5, %c0_6] : memref<1x5x192xbf16, #tpu.memory_space<vmem>>, vector<1x5x16xbf16>
    %6 = vector.shape_cast %5 : vector<1x5x16xbf16> to vector<5x16xbf16>
    %c0_7 = arith.constant 0 : index
    %c0_8 = arith.constant 0 : index
    %c64 = arith.constant 64 : index
    %7 = vector.load %arg1[%c0_7, %c0_8, %c64] : memref<1x5x192xbf16, #tpu.memory_space<vmem>>, vector<1x5x16xbf16>
    %8 = vector.shape_cast %7 : vector<1x5x16xbf16> to vector<5x16xbf16>
    %c0_9 = arith.constant 0 : index
    %c0_10 = arith.constant 0 : index
    %c128 = arith.constant 128 : index
    %9 = vector.load %arg1[%c0_9, %c0_10, %c128] : memref<1x5x192xbf16, #tpu.memory_space<vmem>>, vector<1x5x16xbf16>
    %10 = vector.shape_cast %9 : vector<1x5x16xbf16> to vector<5x16xbf16>
    %cst = arith.constant dense<0.000000e+00> : vector<5x5xf32>
    %11 = tpu.matmul %6, %8, %cst {dimension_numbers = #tpu.dot_dimension_numbers<[1], [1], [0], [0], [0, 0, 1, 0], [], []>} : vector<5x16xbf16>, vector<5x16xbf16>, vector<5x5xf32> -> vector<5x5xf32>
    %cst_11 = arith.constant dense<0xFF800000> : vector<5xf32>
    %12 = vector.multi_reduction <maximumf>, %11, %cst_11 [1] : vector<5x5xf32> to vector<5xf32>
    %13 = vector.shape_cast %12 : vector<5xf32> to vector<5x1xf32>
    %14 = vector.broadcast %13 : vector<5x1xf32> to vector<5x5xf32>
    %15 = arith.subf %11, %14 : vector<5x5xf32>
    %16 = math.exp %15 : vector<5x5xf32>
    %cst_12 = arith.constant dense<0.000000e+00> : vector<5xf32>
    %17 = vector.multi_reduction <add>, %16, %cst_12 [1] : vector<5x5xf32> to vector<5xf32>
    %18 = vector.shape_cast %17 : vector<5xf32> to vector<5x1xf32>
    %19 = vector.broadcast %18 : vector<5x1xf32> to vector<5x5xf32>
    %20 = arith.divf %16, %19 : vector<5x5xf32>
    %21 = arith.truncf %20 : vector<5x5xf32> to vector<5x5xbf16>
    %cst_13 = arith.constant dense<0.000000e+00> : vector<5x16xf32>
    %22 = tpu.matmul %21, %10, %cst_13 {dimension_numbers = #tpu.dot_dimension_numbers<[1], [0], [0], [1], [0, 0, 1, 1], [], []>} : vector<5x5xbf16>, vector<5x16xbf16>, vector<5x16xf32> -> vector<5x16xf32>
    %23 = arith.truncf %22 : vector<5x16xf32> to vector<5x16xbf16>
    %c0_14 = arith.constant 0 : index
    %c0_15 = arith.constant 0 : index
    %24 = vector.load %arg2[%c0_14, %c0_15] : memref<64x64xbf16, #tpu.memory_space<vmem>>, vector<16x64xbf16>
    %cst_16 = arith.constant dense<0.000000e+00> : vector<5x64xf32>
    %25 = tpu.matmul %23, %24, %cst_16 {dimension_numbers = #tpu.dot_dimension_numbers<[1], [0], [0], [1], [0, 0, 1, 1], [], []>} : vector<5x16xbf16>, vector<16x64xbf16>, vector<5x64xf32> -> vector<5x64xf32>
    %26 = arith.addf %4, %25 : vector<5x64xf32>
    %c0_17 = arith.constant 0 : index
    %c0_18 = arith.constant 0 : index
    %c16 = arith.constant 16 : index
    %27 = vector.load %arg1[%c0_17, %c0_18, %c16] : memref<1x5x192xbf16, #tpu.memory_space<vmem>>, vector<1x5x16xbf16>
    %28 = vector.shape_cast %27 : vector<1x5x16xbf16> to vector<5x16xbf16>
    %c0_19 = arith.constant 0 : index
    %c0_20 = arith.constant 0 : index
    %c80 = arith.constant 80 : index
    %29 = vector.load %arg1[%c0_19, %c0_20, %c80] : memref<1x5x192xbf16, #tpu.memory_space<vmem>>, vector<1x5x16xbf16>
    %30 = vector.shape_cast %29 : vector<1x5x16xbf16> to vector<5x16xbf16>
    %c0_21 = arith.constant 0 : index
    %c0_22 = arith.constant 0 : index
    %c144 = arith.constant 144 : index
    %31 = vector.load %arg1[%c0_21, %c0_22, %c144] : memref<1x5x192xbf16, #tpu.memory_space<vmem>>, vector<1x5x16xbf16>
    %32 = vector.shape_cast %31 : vector<1x5x16xbf16> to vector<5x16xbf16>
    %cst_23 = arith.constant dense<0.000000e+00> : vector<5x5xf32>
    %33 = tpu.matmul %28, %30, %cst_23 {dimension_numbers = #tpu.dot_dimension_numbers<[1], [1], [0], [0], [0, 0, 1, 0], [], []>} : vector<5x16xbf16>, vector<5x16xbf16>, vector<5x5xf32> -> vector<5x5xf32>
    %cst_24 = arith.constant dense<0xFF800000> : vector<5xf32>
    %34 = vector.multi_reduction <maximumf>, %33, %cst_24 [1] : vector<5x5xf32> to vector<5xf32>
    %35 = vector.shape_cast %34 : vector<5xf32> to vector<5x1xf32>
    %36 = vector.broadcast %35 : vector<5x1xf32> to vector<5x5xf32>
    %37 = arith.subf %33, %36 : vector<5x5xf32>
    %38 = math.exp %37 : vector<5x5xf32>
    %cst_25 = arith.constant dense<0.000000e+00> : vector<5xf32>
    %39 = vector.multi_reduction <add>, %38, %cst_25 [1] : vector<5x5xf32> to vector<5xf32>
    %40 = vector.shape_cast %39 : vector<5xf32> to vector<5x1xf32>
    %41 = vector.broadcast %40 : vector<5x1xf32> to vector<5x5xf32>
    %42 = arith.divf %38, %41 : vector<5x5xf32>
    %43 = arith.truncf %42 : vector<5x5xf32> to vector<5x5xbf16>
    %cst_26 = arith.constant dense<0.000000e+00> : vector<5x16xf32>
    %44 = tpu.matmul %43, %32, %cst_26 {dimension_numbers = #tpu.dot_dimension_numbers<[1], [0], [0], [1], [0, 0, 1, 1], [], []>} : vector<5x5xbf16>, vector<5x16xbf16>, vector<5x16xf32> -> vector<5x16xf32>
    %45 = arith.truncf %44 : vector<5x16xf32> to vector<5x16xbf16>
    %c16_27 = arith.constant 16 : index
    %c0_28 = arith.constant 0 : index
    %46 = vector.load %arg2[%c16_27, %c0_28] : memref<64x64xbf16, #tpu.memory_space<vmem>>, vector<16x64xbf16>
    %cst_29 = arith.constant dense<0.000000e+00> : vector<5x64xf32>
    %47 = tpu.matmul %45, %46, %cst_29 {dimension_numbers = #tpu.dot_dimension_numbers<[1], [0], [0], [1], [0, 0, 1, 1], [], []>} : vector<5x16xbf16>, vector<16x64xbf16>, vector<5x64xf32> -> vector<5x64xf32>
    %48 = arith.addf %26, %47 : vector<5x64xf32>
    %c0_30 = arith.constant 0 : index
    %c0_31 = arith.constant 0 : index
    %c32 = arith.constant 32 : index
    %49 = vector.load %arg1[%c0_30, %c0_31, %c32] : memref<1x5x192xbf16, #tpu.memory_space<vmem>>, vector<1x5x16xbf16>
    %50 = vector.shape_cast %49 : vector<1x5x16xbf16> to vector<5x16xbf16>
    %c0_32 = arith.constant 0 : index
    %c0_33 = arith.constant 0 : index
    %c96 = arith.constant 96 : index
    %51 = vector.load %arg1[%c0_32, %c0_33, %c96] : memref<1x5x192xbf16, #tpu.memory_space<vmem>>, vector<1x5x16xbf16>
    %52 = vector.shape_cast %51 : vector<1x5x16xbf16> to vector<5x16xbf16>
    %c0_34 = arith.constant 0 : index
    %c0_35 = arith.constant 0 : index
    %c160 = arith.constant 160 : index
    %53 = vector.load %arg1[%c0_34, %c0_35, %c160] : memref<1x5x192xbf16, #tpu.memory_space<vmem>>, vector<1x5x16xbf16>
    %54 = vector.shape_cast %53 : vector<1x5x16xbf16> to vector<5x16xbf16>
    %cst_36 = arith.constant dense<0.000000e+00> : vector<5x5xf32>
    %55 = tpu.matmul %50, %52, %cst_36 {dimension_numbers = #tpu.dot_dimension_numbers<[1], [1], [0], [0], [0, 0, 1, 0], [], []>} : vector<5x16xbf16>, vector<5x16xbf16>, vector<5x5xf32> -> vector<5x5xf32>
    %cst_37 = arith.constant dense<0xFF800000> : vector<5xf32>
    %56 = vector.multi_reduction <maximumf>, %55, %cst_37 [1] : vector<5x5xf32> to vector<5xf32>
    %57 = vector.shape_cast %56 : vector<5xf32> to vector<5x1xf32>
    %58 = vector.broadcast %57 : vector<5x1xf32> to vector<5x5xf32>
    %59 = arith.subf %55, %58 : vector<5x5xf32>
    %60 = math.exp %59 : vector<5x5xf32>
    %cst_38 = arith.constant dense<0.000000e+00> : vector<5xf32>
    %61 = vector.multi_reduction <add>, %60, %cst_38 [1] : vector<5x5xf32> to vector<5xf32>
    %62 = vector.shape_cast %61 : vector<5xf32> to vector<5x1xf32>
    %63 = vector.broadcast %62 : vector<5x1xf32> to vector<5x5xf32>
    %64 = arith.divf %60, %63 : vector<5x5xf32>
    %65 = arith.truncf %64 : vector<5x5xf32> to vector<5x5xbf16>
    %cst_39 = arith.constant dense<0.000000e+00> : vector<5x16xf32>
    %66 = tpu.matmul %65, %54, %cst_39 {dimension_numbers = #tpu.dot_dimension_numbers<[1], [0], [0], [1], [0, 0, 1, 1], [], []>} : vector<5x5xbf16>, vector<5x16xbf16>, vector<5x16xf32> -> vector<5x16xf32>
    %67 = arith.truncf %66 : vector<5x16xf32> to vector<5x16xbf16>
    %c32_40 = arith.constant 32 : index
    %c0_41 = arith.constant 0 : index
    %68 = vector.load %arg2[%c32_40, %c0_41] : memref<64x64xbf16, #tpu.memory_space<vmem>>, vector<16x64xbf16>
    %cst_42 = arith.constant dense<0.000000e+00> : vector<5x64xf32>
    %69 = tpu.matmul %67, %68, %cst_42 {dimension_numbers = #tpu.dot_dimension_numbers<[1], [0], [0], [1], [0, 0, 1, 1], [], []>} : vector<5x16xbf16>, vector<16x64xbf16>, vector<5x64xf32> -> vector<5x64xf32>
    %70 = arith.addf %48, %69 : vector<5x64xf32>
    %c0_43 = arith.constant 0 : index
    %c0_44 = arith.constant 0 : index
    %c48 = arith.constant 48 : index
    %71 = vector.load %arg1[%c0_43, %c0_44, %c48] : memref<1x5x192xbf16, #tpu.memory_space<vmem>>, vector<1x5x16xbf16>
    %72 = vector.shape_cast %71 : vector<1x5x16xbf16> to vector<5x16xbf16>
    %c0_45 = arith.constant 0 : index
    %c0_46 = arith.constant 0 : index
    %c112 = arith.constant 112 : index
    %73 = vector.load %arg1[%c0_45, %c0_46, %c112] : memref<1x5x192xbf16, #tpu.memory_space<vmem>>, vector<1x5x16xbf16>
    %74 = vector.shape_cast %73 : vector<1x5x16xbf16> to vector<5x16xbf16>
    %c0_47 = arith.constant 0 : index
    %c0_48 = arith.constant 0 : index
    %c176 = arith.constant 176 : index
    %75 = vector.load %arg1[%c0_47, %c0_48, %c176] : memref<1x5x192xbf16, #tpu.memory_space<vmem>>, vector<1x5x16xbf16>
    %76 = vector.shape_cast %75 : vector<1x5x16xbf16> to vector<5x16xbf16>
    %cst_49 = arith.constant dense<0.000000e+00> : vector<5x5xf32>
    %77 = tpu.matmul %72, %74, %cst_49 {dimension_numbers = #tpu.dot_dimension_numbers<[1], [1], [0], [0], [0, 0, 1, 0], [], []>} : vector<5x16xbf16>, vector<5x16xbf16>, vector<5x5xf32> -> vector<5x5xf32>
    %cst_50 = arith.constant dense<0xFF800000> : vector<5xf32>
    %78 = vector.multi_reduction <maximumf>, %77, %cst_50 [1] : vector<5x5xf32> to vector<5xf32>
    %79 = vector.shape_cast %78 : vector<5xf32> to vector<5x1xf32>
    %80 = vector.broadcast %79 : vector<5x1xf32> to vector<5x5xf32>
    %81 = arith.subf %77, %80 : vector<5x5xf32>
    %82 = math.exp %81 : vector<5x5xf32>
    %cst_51 = arith.constant dense<0.000000e+00> : vector<5xf32>
    %83 = vector.multi_reduction <add>, %82, %cst_51 [1] : vector<5x5xf32> to vector<5xf32>
    %84 = vector.shape_cast %83 : vector<5xf32> to vector<5x1xf32>
    %85 = vector.broadcast %84 : vector<5x1xf32> to vector<5x5xf32>
    %86 = arith.divf %82, %85 : vector<5x5xf32>
    %87 = arith.truncf %86 : vector<5x5xf32> to vector<5x5xbf16>
    %cst_52 = arith.constant dense<0.000000e+00> : vector<5x16xf32>
    %88 = tpu.matmul %87, %76, %cst_52 {dimension_numbers = #tpu.dot_dimension_numbers<[1], [0], [0], [1], [0, 0, 1, 1], [], []>} : vector<5x5xbf16>, vector<5x16xbf16>, vector<5x16xf32> -> vector<5x16xf32>
    %89 = arith.truncf %88 : vector<5x16xf32> to vector<5x16xbf16>
    %c48_53 = arith.constant 48 : index
    %c0_54 = arith.constant 0 : index
    %90 = vector.load %arg2[%c48_53, %c0_54] : memref<64x64xbf16, #tpu.memory_space<vmem>>, vector<16x64xbf16>
    %cst_55 = arith.constant dense<0.000000e+00> : vector<5x64xf32>
    %91 = tpu.matmul %89, %90, %cst_55 {dimension_numbers = #tpu.dot_dimension_numbers<[1], [0], [0], [1], [0, 0, 1, 1], [], []>} : vector<5x16xbf16>, vector<16x64xbf16>, vector<5x64xf32> -> vector<5x64xf32>
    %92 = arith.addf %70, %91 : vector<5x64xf32>
    %c0_56 = arith.constant 0 : index
    %c0_57 = arith.constant 0 : index
    %c0_58 = arith.constant 0 : index
    %93 = vector.load %arg5[%c0_56, %c0_57, %c0_58] : memref<1x5x64xf32, #tpu.memory_space<vmem>>, vector<1x5x64xf32>
    %94 = vector.shape_cast %93 : vector<1x5x64xf32> to vector<5x64xf32>
    %95 = vector.shape_cast %92 : vector<5x64xf32> to vector<1x5x64xf32>
    tpu.vector_store %arg5[%c0_56, %c0_57, %c0_58], %95 {strides = array<i32>} : memref<1x5x64xf32, #tpu.memory_space<vmem>>, vector<1x5x64xf32>,
    return
  }
  func.func @transform_0(%arg0: i32) -> (i32, i32, i32) {
    %c0_i32 = arith.constant 0 : i32
    %c0_i32_0 = arith.constant 0 : i32
    %c0_i32_1 = arith.constant 0 : i32
    return %arg0, %c0_i32, %c0_i32_0 : i32, i32, i32
  }
  func.func @transform_1(%arg0: i32) -> (i32, i32) {
    %c0_i32 = arith.constant 0 : i32
    %c0_i32_0 = arith.constant 0 : i32
    %c0_i32_1 = arith.constant 0 : i32
    return %c0_i32, %c0_i32_0 : i32, i32
  }
  func.func @transform_2(%arg0: i32) -> (i32, i32) {
    %c0_i32 = arith.constant 0 : i32
    %c0_i32_0 = arith.constant 0 : i32
    %c0_i32_1 = arith.constant 0 : i32
    return %c0_i32, %c0_i32_0 : i32, i32
  }
  func.func @transform_3(%arg0: i32) -> (i32, i32, i32) {
    %c0_i32 = arith.constant 0 : i32
    %c0_i32_0 = arith.constant 0 : i32
    %c0_i32_1 = arith.constant 0 : i32
    return %arg0, %c0_i32, %c0_i32_0 : i32, i32, i32
  }
  func.func @transform_4(%arg0: i32) -> (i32, i32, i32) {
    %c0_i32 = arith.constant 0 : i32
    %c0_i32_0 = arith.constant 0 : i32
    %c0_i32_1 = arith.constant 0 : i32
    return %arg0, %c0_i32, %c0_i32_0 : i32, i32, i32
  }
}

module attributes {stable_mosaic.version = 11 : i64} {
  func.func @_ln_linear_kernel(%arg0: i32, %arg1: i32, %arg2: memref<10x64xf32, #tpu.memory_space<vmem>>, %arg3: memref<1x64xf32, #tpu.memory_space<vmem>>, %arg4: memref<1x64xf32, #tpu.memory_space<vmem>>, %arg5: memref<64x128xbf16, #tpu.memory_space<vmem>>, %arg6: memref<1x128xf32, #tpu.memory_space<vmem>>, %arg7: memref<10x128xbf16, #tpu.memory_space<vmem>>, %arg8: memref<10x64xbf16, #tpu.memory_space<vmem>>) attributes {dimension_semantics = [#tpu.dimension_semantics<parallel>, #tpu.dimension_semantics<arbitrary>], iteration_bounds = array<i64: 1, 1>, scalar_prefetch = 0 : i64, scratch_operands = 1 : i64, tpu.core_type = #tpu.core_type<tc>, window_params = [{transform_indices = @transform_0, window_bounds = array<i64: 10, 64>}, {pipeline_mode = #tpu.pipeline_mode<synchronous>, transform_indices = @transform_1, window_bounds = array<i64: 1, 64>}, {pipeline_mode = #tpu.pipeline_mode<synchronous>, transform_indices = @transform_2, window_bounds = array<i64: 1, 64>}, {transform_indices = @transform_3, window_bounds = array<i64: 64, 128>}, {transform_indices = @transform_4, window_bounds = array<i64: 1, 128>}, {transform_indices = @transform_5, window_bounds = array<i64: 10, 128>}]} {
    %c0_i32 = arith.constant 0 : i32
    %0 = arith.cmpi eq, %arg1, %c0_i32 : i32
    %1 = arith.extui %0 : i1 to i32
    %c0_i32_0 = arith.constant 0 : i32
    %2 = arith.cmpi ne, %1, %c0_i32_0 : i32
    scf.if %2 {
      %c0_10 = arith.constant 0 : index
      %c0_11 = arith.constant 0 : index
      %19 = vector.load %arg2[%c0_10, %c0_11] : memref<10x64xf32, #tpu.memory_space<vmem>>, vector<10x64xf32>
      %cst_12 = arith.constant dense<0.000000e+00> : vector<10xf32>
      %20 = vector.multi_reduction <add>, %19, %cst_12 [1] : vector<10x64xf32> to vector<10xf32>
      %21 = vector.shape_cast %20 : vector<10xf32> to vector<10x1xf32>
      %cst_13 = arith.constant 6.400000e+01 : f32
      %22 = vector.broadcast %cst_13 : f32 to vector<10x1xf32>
      %23 = arith.divf %21, %22 : vector<10x1xf32>
      %24 = vector.broadcast %23 : vector<10x1xf32> to vector<10x64xf32>
      %25 = arith.subf %19, %24 : vector<10x64xf32>
      %26 = arith.mulf %25, %25 : vector<10x64xf32>
      %cst_14 = arith.constant dense<0.000000e+00> : vector<10xf32>
      %27 = vector.multi_reduction <add>, %26, %cst_14 [1] : vector<10x64xf32> to vector<10xf32>
      %28 = vector.shape_cast %27 : vector<10xf32> to vector<10x1xf32>
      %cst_15 = arith.constant 6.400000e+01 : f32
      %29 = vector.broadcast %cst_15 : f32 to vector<10x1xf32>
      %30 = arith.divf %28, %29 : vector<10x1xf32>
      %31 = vector.broadcast %23 : vector<10x1xf32> to vector<10x64xf32>
      %32 = arith.subf %19, %31 : vector<10x64xf32>
      %cst_16 = arith.constant 9.99999974E-6 : f32
      %33 = vector.broadcast %cst_16 : f32 to vector<10x1xf32>
      %34 = arith.addf %30, %33 : vector<10x1xf32>
      %35 = math.rsqrt %34 : vector<10x1xf32>
      %36 = vector.broadcast %35 : vector<10x1xf32> to vector<10x64xf32>
      %37 = arith.mulf %32, %36 : vector<10x64xf32>
      %c0_17 = arith.constant 0 : index
      %c0_18 = arith.constant 0 : index
      %38 = vector.load %arg3[%c0_17, %c0_18] : memref<1x64xf32, #tpu.memory_space<vmem>>, vector<1x64xf32>
      %39 = vector.broadcast %38 : vector<1x64xf32> to vector<10x64xf32>
      %40 = arith.mulf %37, %39 : vector<10x64xf32>
      %c0_19 = arith.constant 0 : index
      %c0_20 = arith.constant 0 : index
      %41 = vector.load %arg4[%c0_19, %c0_20] : memref<1x64xf32, #tpu.memory_space<vmem>>, vector<1x64xf32>
      %42 = vector.broadcast %41 : vector<1x64xf32> to vector<10x64xf32>
      %43 = arith.addf %40, %42 : vector<10x64xf32>
      %44 = arith.truncf %43 : vector<10x64xf32> to vector<10x64xbf16>
      %c0_21 = arith.constant 0 : index
      %c0_22 = arith.constant 0 : index
      %45 = vector.load %arg8[%c0_21, %c0_22] : memref<10x64xbf16, #tpu.memory_space<vmem>>, vector<10x64xbf16>
      tpu.vector_store %arg8[%c0_21, %c0_22], %44 {strides = array<i32>} : memref<10x64xbf16, #tpu.memory_space<vmem>>, vector<10x64xbf16>,
    } else {
    }
    %c0 = arith.constant 0 : index
    %c0_1 = arith.constant 0 : index
    %3 = vector.load %arg8[%c0, %c0_1] : memref<10x64xbf16, #tpu.memory_space<vmem>>, vector<10x64xbf16>
    %c0_2 = arith.constant 0 : index
    %c0_3 = arith.constant 0 : index
    %4 = vector.load %arg5[%c0_2, %c0_3] : memref<64x128xbf16, #tpu.memory_space<vmem>>, vector<64x128xbf16>
    %cst = arith.constant dense<0.000000e+00> : vector<10x128xf32>
    %5 = tpu.matmul %3, %4, %cst {dimension_numbers = #tpu.dot_dimension_numbers<[1], [0], [0], [1], [0, 0, 1, 1], [], []>} : vector<10x64xbf16>, vector<64x128xbf16>, vector<10x128xf32> -> vector<10x128xf32>
    %c0_4 = arith.constant 0 : index
    %c0_5 = arith.constant 0 : index
    %6 = vector.load %arg6[%c0_4, %c0_5] : memref<1x128xf32, #tpu.memory_space<vmem>>, vector<1x128xf32>
    %7 = vector.broadcast %6 : vector<1x128xf32> to vector<10x128xf32>
    %8 = arith.addf %5, %7 : vector<10x128xf32>
    %cst_6 = arith.constant 1.702000e+00 : f32
    %9 = vector.broadcast %cst_6 : f32 to vector<10x128xf32>
    %10 = arith.mulf %9, %8 : vector<10x128xf32>
    %11 = arith.negf %10 : vector<10x128xf32>
    %12 = math.exp %11 : vector<10x128xf32>
    %cst_7 = arith.constant 1.000000e+00 : f32
    %13 = vector.broadcast %cst_7 : f32 to vector<10x128xf32>
    %14 = arith.addf %13, %12 : vector<10x128xf32>
    %15 = arith.divf %13, %14 : vector<10x128xf32>
    %16 = arith.mulf %8, %15 : vector<10x128xf32>
    %17 = arith.truncf %16 : vector<10x128xf32> to vector<10x128xbf16>
    %c0_8 = arith.constant 0 : index
    %c0_9 = arith.constant 0 : index
    %18 = vector.load %arg7[%c0_8, %c0_9] : memref<10x128xbf16, #tpu.memory_space<vmem>>, vector<10x128xbf16>
    tpu.vector_store %arg7[%c0_8, %c0_9], %17 {strides = array<i32>} : memref<10x128xbf16, #tpu.memory_space<vmem>>, vector<10x128xbf16>,
    return
  }
  func.func @transform_0(%arg0: i32, %arg1: i32) -> (i32, i32) {
    %c0_i32 = arith.constant 0 : i32
    %c0_i32_0 = arith.constant 0 : i32
    return %arg0, %c0_i32 : i32, i32
  }
  func.func @transform_1(%arg0: i32, %arg1: i32) -> (i32, i32) {
    %c0_i32 = arith.constant 0 : i32
    %c0_i32_0 = arith.constant 0 : i32
    %c0_i32_1 = arith.constant 0 : i32
    return %c0_i32, %c0_i32_0 : i32, i32
  }
  func.func @transform_2(%arg0: i32, %arg1: i32) -> (i32, i32) {
    %c0_i32 = arith.constant 0 : i32
    %c0_i32_0 = arith.constant 0 : i32
    %c0_i32_1 = arith.constant 0 : i32
    return %c0_i32, %c0_i32_0 : i32, i32
  }
  func.func @transform_3(%arg0: i32, %arg1: i32) -> (i32, i32) {
    %c0_i32 = arith.constant 0 : i32
    %c0_i32_0 = arith.constant 0 : i32
    return %c0_i32, %arg1 : i32, i32
  }
  func.func @transform_4(%arg0: i32, %arg1: i32) -> (i32, i32) {
    %c0_i32 = arith.constant 0 : i32
    %c0_i32_0 = arith.constant 0 : i32
    return %c0_i32, %arg1 : i32, i32
  }
  func.func @transform_5(%arg0: i32, %arg1: i32) -> (i32, i32) {
    %c0_i32 = arith.constant 0 : i32
    return %arg0, %arg1 : i32, i32
  }
}

module attributes {stable_mosaic.version = 11 : i64} {
  func.func @_tiled_linear_kernel(%arg0: i32, %arg1: i32, %arg2: i32, %arg3: memref<10x128xbf16, #tpu.memory_space<vmem>>, %arg4: memref<128x64xbf16, #tpu.memory_space<vmem>>, %arg5: memref<1x64xf32, #tpu.memory_space<vmem>>, %arg6: memref<10x64xf32, #tpu.memory_space<vmem>>, %arg7: memref<10x64xf32, #tpu.memory_space<vmem>>, %arg8: memref<10x64xf32, #tpu.memory_space<vmem>>) attributes {dimension_semantics = [#tpu.dimension_semantics<parallel>, #tpu.dimension_semantics<parallel>, #tpu.dimension_semantics<arbitrary>], iteration_bounds = array<i64: 1, 1, 1>, scalar_prefetch = 0 : i64, scratch_operands = 1 : i64, tpu.core_type = #tpu.core_type<tc>, window_params = [{transform_indices = @transform_0, window_bounds = array<i64: 10, 128>}, {transform_indices = @transform_1, window_bounds = array<i64: 128, 64>}, {transform_indices = @transform_2, window_bounds = array<i64: 1, 64>}, {transform_indices = @transform_3, window_bounds = array<i64: 10, 64>}, {transform_indices = @transform_4, window_bounds = array<i64: 10, 64>}]} {
    %c0_i32 = arith.constant 0 : i32
    %0 = arith.cmpi eq, %arg2, %c0_i32 : i32
    %1 = arith.extui %0 : i1 to i32
    %c0_i32_0 = arith.constant 0 : i32
    %2 = arith.cmpi ne, %1, %c0_i32_0 : i32
    scf.if %2 {
      %cst_10 = arith.constant 0.000000e+00 : f32
      %12 = vector.broadcast %cst_10 : f32 to vector<10x64xf32>
      %c0_11 = arith.constant 0 : index
      %c0_12 = arith.constant 0 : index
      %13 = vector.load %arg8[%c0_11, %c0_12] : memref<10x64xf32, #tpu.memory_space<vmem>>, vector<10x64xf32>
      tpu.vector_store %arg8[%c0_11, %c0_12], %12 {strides = array<i32>} : memref<10x64xf32, #tpu.memory_space<vmem>>, vector<10x64xf32>,
    } else {
    }
    %c0 = arith.constant 0 : index
    %c0_1 = arith.constant 0 : index
    %3 = vector.load %arg8[%c0, %c0_1] : memref<10x64xf32, #tpu.memory_space<vmem>>, vector<10x64xf32>
    %c0_2 = arith.constant 0 : index
    %c0_3 = arith.constant 0 : index
    %4 = vector.load %arg3[%c0_2, %c0_3] : memref<10x128xbf16, #tpu.memory_space<vmem>>, vector<10x128xbf16>
    %c0_4 = arith.constant 0 : index
    %c0_5 = arith.constant 0 : index
    %5 = vector.load %arg4[%c0_4, %c0_5] : memref<128x64xbf16, #tpu.memory_space<vmem>>, vector<128x64xbf16>
    %cst = arith.constant dense<0.000000e+00> : vector<10x64xf32>
    %6 = tpu.matmul %4, %5, %cst {dimension_numbers = #tpu.dot_dimension_numbers<[1], [0], [0], [1], [0, 0, 1, 1], [], []>} : vector<10x128xbf16>, vector<128x64xbf16>, vector<10x64xf32> -> vector<10x64xf32>
    %7 = arith.addf %3, %6 : vector<10x64xf32>
    %c0_6 = arith.constant 0 : index
    %c0_7 = arith.constant 0 : index
    %8 = vector.load %arg8[%c0_6, %c0_7] : memref<10x64xf32, #tpu.memory_space<vmem>>, vector<10x64xf32>
    tpu.vector_store %arg8[%c0_6, %c0_7], %7 {strides = array<i32>} : memref<10x64xf32, #tpu.memory_space<vmem>>, vector<10x64xf32>,
    %c0_i32_8 = arith.constant 0 : i32
    %9 = arith.cmpi eq, %arg2, %c0_i32_8 : i32
    %10 = arith.extui %9 : i1 to i32
    %c0_i32_9 = arith.constant 0 : i32
    %11 = arith.cmpi ne, %10, %c0_i32_9 : i32
    scf.if %11 {
      %c0_10 = arith.constant 0 : index
      %c0_11 = arith.constant 0 : index
      %12 = vector.load %arg8[%c0_10, %c0_11] : memref<10x64xf32, #tpu.memory_space<vmem>>, vector<10x64xf32>
      %c0_12 = arith.constant 0 : index
      %c0_13 = arith.constant 0 : index
      %13 = vector.load %arg5[%c0_12, %c0_13] : memref<1x64xf32, #tpu.memory_space<vmem>>, vector<1x64xf32>
      %14 = vector.broadcast %13 : vector<1x64xf32> to vector<10x64xf32>
      %15 = arith.addf %12, %14 : vector<10x64xf32>
      %c0_14 = arith.constant 0 : index
      %c0_15 = arith.constant 0 : index
      %16 = vector.load %arg6[%c0_14, %c0_15] : memref<10x64xf32, #tpu.memory_space<vmem>>, vector<10x64xf32>
      %17 = arith.addf %15, %16 : vector<10x64xf32>
      %c0_16 = arith.constant 0 : index
      %c0_17 = arith.constant 0 : index
      %18 = vector.load %arg7[%c0_16, %c0_17] : memref<10x64xf32, #tpu.memory_space<vmem>>, vector<10x64xf32>
      tpu.vector_store %arg7[%c0_16, %c0_17], %17 {strides = array<i32>} : memref<10x64xf32, #tpu.memory_space<vmem>>, vector<10x64xf32>,
    } else {
    }
    return
  }
  func.func @transform_0(%arg0: i32, %arg1: i32, %arg2: i32) -> (i32, i32) {
    %c0_i32 = arith.constant 0 : i32
    return %arg0, %arg2 : i32, i32
  }
  func.func @transform_1(%arg0: i32, %arg1: i32, %arg2: i32) -> (i32, i32) {
    %c0_i32 = arith.constant 0 : i32
    return %arg2, %arg1 : i32, i32
  }
  func.func @transform_2(%arg0: i32, %arg1: i32, %arg2: i32) -> (i32, i32) {
    %c0_i32 = arith.constant 0 : i32
    %c0_i32_0 = arith.constant 0 : i32
    return %c0_i32, %arg1 : i32, i32
  }
  func.func @transform_3(%arg0: i32, %arg1: i32, %arg2: i32) -> (i32, i32) {
    %c0_i32 = arith.constant 0 : i32
    return %arg0, %arg1 : i32, i32
  }
  func.func @transform_4(%arg0: i32, %arg1: i32, %arg2: i32) -> (i32, i32) {
    %c0_i32 = arith.constant 0 : i32
    return %arg0, %arg1 : i32, i32
  }
}

</mosaic_0001>

<bundles_post_ra>
// kernel: _lambda_.11
= control target key start
LH: loop header
LB: loop body
LE: loop exit
PB: predicated region body
PF: predicated region fallthrough
CT: control target
= control target key end

     0   :  { %s373_s18 = smov 0   ;;  %s409_s0 = inlined_call_operand.vmem [shape: f32[2,4,64], index: 0, kind: input, shape index: {}]   ;;  %s410_s1 = inlined_call_operand.vmem [shape: f32[1,64], index: 1, kind: input, shape index: {}]   ;;  %s411_s2 = inlined_call_operand.vmem [shape: f32[5,64], index: 2, kind: input, shape index: {}]   ;;  %s412_s3 = inlined_call_operand.vmem [shape: f32[1,64], index: 3, kind: input, shape index: {}]   ;;  %s413_s4 = inlined_call_operand.vmem [shape: f32[1,64], index: 4, kind: input, shape index: {}]   ;;  %s414_s5 = inlined_call_operand.vmem [shape: f32[2,5,64], index: 5, kind: output, shape index: {}]  }
   0x1 LB: > { %s314_s19 = sadd.s32 4294967295, %s341_s18   ;;  %p318_p0 = scmp.ge.s32.totalorder %s341_s18, 1  ;;  %s341_s18 = sphi %s373_s18, %s15_s18  }
   0x2   : > { %p186_p1 = scmp.lt.s32.totalorder %s341_s18, 3 }
   0x4   : > { %p187_p2 = pnand %p318_p0, %p186_p1 }
   0x5   : > { %p212_p3 = scmp.lt.s32.totalorder (!%p187_p2), %s314_s19, 1  ;;  %v220_v0 = vld [vmem:[%s410_s1] sm:$0x1] (!%p187_p2)  ;;  %vm225_vm0 = vcmask (!%p187_p2), 1040384   ;;  %vm229_vm1 = vcmask (!%p187_p2), 520192  }
   0x6   : > { %190 = sbr.rel (%p187_p2) target bundleno = 336 (0x150), region = 40  ;;  %v227_v3 = vld [vmem:[%s411_s2] sm:$0x1f] (!%p187_p2) }
   0x7   : > { %v321_v16 = vld [vmem:[%s412_s3] ss:$0 sm:$0xff] (!%p187_p2) }
   0x8   : > { %v322_v18 = vld [vmem:[%s413_s4] ss:$0 sm:$0xff] (!%p187_p2) }
   0xd   : > { %s416_s19 = smov (!%p212_p3, %s314_s19), 1 }
   0xe   : > { %s319_s20 = sshll.u32 %s416_s19, 2  ;;  %s320_s30 = sshll.u32 %s416_s19, 3 }
   0xf   : > { %s215_s23 = scalar_lea.vmem %s409_s0, %s319_s20  ;;  %s219_s10 = scalar_lea.vmem %s414_s5, %s320_s30 }
  0x10   : > { %v221_v1 = vld [vmem:[%s215_s23] sm:$0xf] }
  0x11   : > { %v223_v2 = vrot.slane %v221_v1, 7 }
  0x13   : > { %v226_v4 = vsel %vm225_vm0, %v220_v0, %v223_v2 }
  0x14   : > { %v228_v5 = vadd.f32 %v227_v3, %v226_v4 }
  0x16   : > { %v230_v6 = vsel %vm229_vm1, %v228_v5, 0.0 }
  0x17   : > { %231 = vadd.xlane.f32.xlu0 %v230_v6 }
  0xa4   : > { %v232_v7 = vpop.xlane.xlu0 %231 }
  0xa5   : > { %v234_v8 = vmul.f32 0.015625, %v232_v7 }
  0xa7   : > { %v235_v9 = vsub.f32 %v228_v5, %v234_v8 }
  0xa9   : > { %v236_v10 = vmul.f32 %v235_v9, %v235_v9 }
  0xab   : > { %v237_v11 = vsel %vm229_vm1, %v236_v10, 0.0 }
  0xac   : > { %238 = vadd.xlane.f32.xlu0 %v237_v11 }
 0x139   : > { %v239_v12 = vpop.xlane.xlu0 %238 }
 0x13a   : > { %v240_v13 = vmul.f32 0.015625, %v239_v12 }
 0x13c   : > { %v241_v14 = vadd.f32 1e-05, %v240_v13 }
 0x13e   : > { %333 = vrsqrt.f32 %v241_v14 }
 0x148   : > { %v334_v15 = vpop.eup %333 }
 0x149   : > { %v243_v17 = vmul.f32 %v334_v15, %v235_v9 }
 0x14b   : > { %v251_v19 = vmul.f32 %v321_v16, %v243_v17 }
 0x14d   : > { %v259_v20 = vadd.f32 %v322_v18, %v251_v19 }
 0x14f   : > { %260 = vst.msk [vmem:[%s219_s10] sm:$0x1f] %vm229_vm1, %v259_v20 }
 0x150 PF: > { %s15_s18 = sadd.s32 1, %s341_s18  }
 0x151   : > { %p12_p4 = scmp.ge.s32.totalorder %s15_s18, 4  }
 0x153   :  { %14 = sbr.rel (!%p12_p4) target bundleno = 1 (0x1), region = 70 }

// kernel: _lambda_.10
= control target key start
LH: loop header
LB: loop body
LE: loop exit
PB: predicated region body
PF: predicated region fallthrough
CT: control target
= control target key end

     0   :  { %vm16_vm0 = vcmask 523264   ;;  %v201_v0 = vmov 0   ;;  %v202_v2 = vmov 0.0   ;;  %s267_s1 = inlined_call_operand.vmem [shape: bf16[192,64], index: 1, kind: input, shape index: {}]   ;;  %s268_s0 = inlined_call_operand.vmem [shape: f32[8,192], index: 0, kind: input, shape index: {}]   ;;  %s269_s2 = inlined_call_operand.vmem [shape: f32[8,64], index: 2, kind: output, shape index: {}]  }
   0x1   :  { %123 = vmatprep.subr.bf16.mxu0 %v201_v0  ;;  %v189_v1 = vld [vmem:[%s267_s1] sm:$0xff]   ;;  %17 = vst.msk [vmem:[#allocation2] sm:$0xff] %vm16_vm0, %v202_v2  ;;  %v190_v3 = vld [vmem:[%s267_s1 + $0x8] sm:$0xff]   ;;  %v191_v4 = vld [vmem:[%s267_s1 + $0x10] sm:$0xff]  }
   0x2   :  { %124 = vmatpush1.bf16.msra.mxu0 %v189_v1  ;;  %v192_v5 = vld [vmem:[%s267_s1 + $0x18] sm:$0xff]   ;;  %v20_v6 = vld [vmem:[%s268_s0 + $0x8] sm:$0xff]  ;;  %v193_v8 = vld [vmem:[%s267_s1 + $0x20] sm:$0xff]  }
   0x3   :  { %125 = vmatprep.subr.bf16.mxu0 %v201_v0  ;;  %v22_v7 = vpack.c.bf16 %v20_v6, %v20_v6  ;;  %v194_v9 = vld [vmem:[%s267_s1 + $0x28] sm:$0xff]   ;;  %v195_v10 = vld [vmem:[%s267_s1 + $0x30] sm:$0xff]   ;;  %v196_v11 = vld [vmem:[%s267_s1 + $0x38] sm:$0xff]  }
   0x4   :  { %v197_v12 = vld [vmem:[%s267_s1 + $0x40] sm:$0xff]   ;;  %v198_v13 = vld [vmem:[%s267_s1 + $0x48] sm:$0xff]   ;;  %v199_v14 = vld [vmem:[%s267_s1 + $0x50] sm:$0xff]  }
   0x5   :  { %186 = vmatprep.mubr.msk.bf16.mxu0 %vm16_vm0, %v22_v7  ;;  %v200_v15 = vld [vmem:[%s267_s1 + $0x58] sm:$0xff]   ;;  %v19_v16 = vld [vmem:[%s268_s0] sm:$0xff] }
   0x6   :  { %126 = vmatpush1.bf16.msra.mxu0 %v190_v3  ;;  %v21_v17 = vpack.c.bf16 %v19_v16, %v19_v16 }
   0x7   :  { %127 = vmatprep.subr.bf16.mxu0 %v201_v0 }
   0x8   :  { %v18_v18 = vld [vmem:[#allocation2] sm:$0xff] }
   0xa   :  { %128 = vmatpush1.bf16.msra.mxu0 %v191_v4 }
   0xb   :  { %129 = vmatprep.subr.bf16.mxu0 %v201_v0 }
   0xe   :  { %130 = vmatpush1.bf16.msra.mxu0 %v192_v5 }
   0xf   :  { %131 = vmatprep.subr.bf16.mxu0 %v201_v0 }
  0x12   :  { %132 = vmatpush1.bf16.msra.mxu0 %v193_v8 }
  0x13   :  { %133 = vmatprep.subr.bf16.mxu0 %v201_v0 }
  0x16   :  { %134 = vmatpush1.bf16.msra.mxu0 %v194_v9 }
  0x17   :  { %135 = vmatprep.subr.bf16.mxu0 %v201_v0 }
  0x1a   :  { %136 = vmatpush1.bf16.msra.mxu0 %v195_v10 }
  0x1b   :  { %137 = vmatprep.subr.bf16.mxu0 %v201_v0 }
  0x1e   :  { %138 = vmatpush1.bf16.msra.mxu0 %v196_v11 }
  0x1f   :  { %139 = vmatprep.subr.bf16.mxu0 %v201_v0 }
  0x22   :  { %140 = vmatpush1.bf16.msra.mxu0 %v197_v12 }
  0x23   :  { %141 = vmatprep.subr.bf16.mxu0 %v201_v0 }
  0x26   :  { %142 = vmatpush1.bf16.msra.mxu0 %v198_v13 }
  0x27   :  { %143 = vmatprep.subr.bf16.mxu0 %v201_v0 }
  0x2a   :  { %144 = vmatpush1.bf16.msra.mxu0 %v199_v14 }
  0x2b   :  { %145 = vmatprep.subr.bf16.mxu0 %v201_v0 }
  0x2e   :  { %146 = vmatpush1.bf16.msra.mxu0 %v200_v15 }
  0x31   :  { %156 = vmatmul.mubr.bf16.vlgmr.msra.gmra.mrb[0].mxu0 %v21_v17 }
 0x104   :  { %v157_v19 = vpop.f32.mrb[0].mxu0 }
 0x105   :  { %v163_v20 = vadd.f32 %v157_v19, %v18_v18  ;;  %v159_v21 = vpop.f32.mrb[1].mxu0 }
 0x106   :  { %v160_v22 = vpop.f32.mrb[2].mxu0 }
 0x107   :  { %164 = vst.msk [vmem:[#allocation2] sm:$0xff] %vm16_vm0, %v163_v20  ;;  %v161_v23 = vpop.f32.mrb[3].mxu0 }
 0x10e   :  { %v168_v24 = vld [vmem:[#allocation2] sm:$0xff] }
 0x10f   :  { %169 = vst.msk [vmem:[%s269_s2] sm:$0xff] %vm16_vm0, %v168_v24 }

// kernel: _lambda_.12
= control target key start
LH: loop header
LB: loop body
LE: loop exit
PB: predicated region body
PF: predicated region fallthrough
CT: control target
= control target key end

     0   :  { %vm27_vm0 = vcmask 523264   ;;  %vm31_vm1 = vcmask 517120   ;;  %v262_v22 = vmov 0   ;;  %vm82_vm2 = vcmask 519168   ;;  %s341_s0 = inlined_call_operand.vmem [shape: f32[10,64], index: 0, kind: input, shape index: {}]   ;;  %s342_s3 = inlined_call_operand.vmem [shape: bf16[64,192], index: 3, kind: input, shape index: {}]   ;;  %s343_s1 = inlined_call_operand.vmem [shape: f32[1,64], index: 1, kind: input, shape index: {}]   ;;  %s344_s2 = inlined_call_operand.vmem [shape: f32[1,64], index: 2, kind: input, shape index: {}]   ;;  %s345_s4 = inlined_call_operand.vmem [shape: f32[1,192], index: 4, kind: input, shape index: {}]   ;;  %s346_s5 = inlined_call_operand.vmem [shape: bf16[10,192], index: 5, kind: output, shape index: {}]  }
   0x1   :  { %v25_v0 = vld [vmem:[%s341_s0] sm:$0xff]  ;;  %v26_v1 = vld [vmem:[%s341_s0 + $0x8] sm:$0x3]  ;;  %v248_v16 = vld [vmem:[%s342_s3 + $0x14] ss:$8 sps:$4 sm:$0xff]   ;;  %189 = vmatprep.mubr.bf16.mxu0 %v262_v22  ;;  %vm84_vm3 = vcmask 516096   ;;  %v98_v42 = vlaneseq }
   0x2   :  { %v28_v2 = vsel %vm27_vm0, %v25_v0, 0.0  ;;  %v32_v3 = vsel %vm31_vm1, %v26_v1, 0.0  ;;  %v245_v14 = vld [vmem:[%s342_s3 + $0x4] ss:$8 sps:$4 sm:$0xff]   ;;  %v247_v15 = vld [vmem:[%s342_s3] ss:$8 sps:$4 sm:$0xff]  }
   0x3   :  { %29 = vadd.xlane.f32.xlu0 %v28_v2  ;;  %157 = vmatprep.subr.bf16.mxu0 %v245_v14  ;;  %v250_v17 = vld [vmem:[%s342_s3 + $0x10] ss:$8 sps:$4 sm:$0xff]   ;;  %v251_v18 = vld [vmem:[%s342_s3 + $0x24] ss:$8 sps:$4 sm:$0xff]   ;;  %v253_v19 = vld [vmem:[%s342_s3 + $0x20] ss:$8 sps:$4 sm:$0xff]  }
   0x4   :  { %158 = vmatpush1.bf16.msra.mxu0 %v247_v15  ;;  %v254_v20 = vld [vmem:[%s342_s3 + $0x34] ss:$8 sps:$4 sm:$0xff]   ;;  %v256_v21 = vld [vmem:[%s342_s3 + $0x30] ss:$8 sps:$4 sm:$0xff]   ;;  %v224_v30 = vld [vmem:[%s343_s1] ss:$0 sm:$0xff] }
   0x5   :  { %159 = vmatprep.subr.bf16.mxu0 %v248_v16  ;;  %v225_v32 = vld [vmem:[%s344_s2] ss:$0 sm:$0xff]  ;;  %v99_v43 = vshrl.u32 %v98_v42, 7  ;;  %vm212_vm4 = vcmask 1043456   ;;  %vm213_vm5 = vcmask 523268   ;;  %vm216_vm6 = vcmask 1040384  }
   0x6   :  { %v96_v45 = vld [vmem:[%s345_s4] sm:$0x3]  ;;  %vm217_vm7 = vcmask 520196   ;;  %vm214_vm8 = vmor %vm213_vm5, %vm212_vm4 }
   0x7   :  { %33 = vadd.xlane.f32.xlu0 %v32_v3  ;;  %v100_v44 = vsub.s32 0, %v99_v43  ;;  %v104_v46 = vsub.s32 1, %v99_v43  ;;  %vm218_vm9 = vmor %vm217_vm7, %vm216_vm6 }
   0x8   :  { %160 = vmatpush1.bf16.msra.mxu0 %v250_v17 }
   0x9   :  { %161 = vmatprep.subr.bf16.mxu0 %v251_v18  ;;  %v101_v47 = vrot.slane %v96_v45, %v100_v44  ;;  %v105_v48 = vrot.slane %v96_v45, %v104_v46 }
   0xc   :  { %162 = vmatpush1.bf16.msra.mxu0 %v253_v19 }
   0xd   :  { %163 = vmatprep.subr.bf16.mxu0 %v254_v20 }
  0x10   :  { %164 = vmatpush1.bf16.msra.mxu0 %v256_v21 }
  0x90   :  { %v30_v4 = vpop.xlane.xlu0 %29 }
  0x91   :  { %v36_v5 = vmul.f32 0.015625, %v30_v4 }
  0x93   :  { %v38_v6 = vsub.f32 %v25_v0, %v36_v5 }
  0x94   :  { %v34_v7 = vpop.xlane.xlu0 %33 }
  0x95   :  { %v37_v8 = vmul.f32 0.015625, %v34_v7  ;;  %v40_v9 = vmul.f32 %v38_v6, %v38_v6 }
  0x97   :  { %v39_v10 = vsub.f32 %v26_v1, %v37_v8  ;;  %v42_v11 = vsel %vm27_vm0, %v40_v9, 0.0 }
  0x98   :  { %43 = vadd.xlane.f32.xlu1 %v42_v11 }
  0x99   :  { %v41_v12 = vmul.f32 %v39_v10, %v39_v10 }
  0x9b   :  { %v45_v13 = vsel %vm31_vm1, %v41_v12, 0.0 }
  0x9c   :  { %46 = vadd.xlane.f32.xlu1 %v45_v13 }
 0x125   :  { %v44_v23 = vpop.xlane.xlu1 %43 }
 0x126   :  { %v48_v24 = vmul.f32 0.015625, %v44_v23 }
 0x128   :  { %v50_v25 = vadd.f32 1e-05, %v48_v24 }
 0x129   :  { %v47_v26 = vpop.xlane.xlu1 %46 }
 0x12a   :  { %258 = vrsqrt.f32 %v50_v25  ;;  %v49_v27 = vmul.f32 0.015625, %v47_v26 }
 0x12c   :  { %v51_v28 = vadd.f32 1e-05, %v49_v27 }
 0x12e   :  { %260 = vrsqrt.f32 %v51_v28 }
 0x134   :  { %v259_v29 = vpop.eup %258 }
 0x135   :  { %v54_v31 = vmul.f32 %v259_v29, %v38_v6 }
 0x137   :  { %v63_v33 = vmul.f32 %v224_v30, %v54_v31 }
 0x138   :  { %v261_v34 = vpop.eup %260 }
 0x139   :  { %v72_v35 = vadd.f32 %v225_v32, %v63_v33  ;;  %v55_v36 = vmul.f32 %v261_v34, %v39_v10 }
 0x13b   :  { %v240_v37 = vpack.c.bf16 %v72_v35, %v72_v35  ;;  %v64_v38 = vmul.f32 %v224_v30, %v55_v36 }
 0x13d   :  { %83 = vst.msk [vmem:[#allocation2] sm:$0xf] %vm82_vm2, %v240_v37  ;;  %v73_v39 = vadd.f32 %v225_v32, %v64_v38 }
 0x13f   :  { %v241_v40 = vpack.c.bf16 %v73_v39, %v73_v39 }
 0x141   :  { %85 = vst.msk [vmem:[#allocation2 + $0x4] sm:$0x1] %vm84_vm3, %v241_v40 }
 0x148   :  { %v257_v41 = vld [vmem:[#allocation2] sm:$0x1f]  }
 0x149   :  { %237 = vmatmul.mubr.msk.bf16.vlgmr.msra.gmra.mrb[0].mxu0 %vm27_vm0, %v257_v41 }
 0x21c   :  { %v191_v49 = vpop.f32.mrb[0].mxu0 }
 0x21d   :  { %v192_v50 = vadd.f32 %v191_v49, %v101_v47  ;;  %v193_v51 = vpop.f32.mrb[1].mxu0 }
 0x21e   :  { %v194_v52 = vadd.f32 %v193_v51, %v105_v48  ;;  %v195_v53 = vpop.f32.mrb[2].mxu0 }
 0x21f   :  { %v196_v54 = vadd.f32 %v195_v53, %v101_v47  ;;  %v197_v55 = vpop.f32.mrb[3].mxu0 }
 0x220   :  { %v242_v56 = vpack.c.bf16 %v194_v52, %v192_v50  ;;  %v198_v57 = vadd.f32 %v197_v55, %v105_v48 }
 0x222   :  { %215 = vst.msk [vmem:[%s346_s5] sm:$0xff] %vm214_vm8, %v242_v56  ;;  %v243_v58 = vpack.c.bf16 %v198_v57, %v196_v54 }
 0x224   :  { %219 = vst.msk [vmem:[%s346_s5 + $0x8] sm:$0x11] %vm218_vm9, %v243_v58 }

// kernel: _lambda_.13
= control target key start
LH: loop header
LB: loop body
LE: loop exit
PB: predicated region body
PF: predicated region fallthrough
CT: control target
= control target key end

     0   :  { %s1176_s15 = smov 0   ;;  %s1304_s0 = inlined_call_operand.vmem [shape: bf16[2,5,192], index: 0, kind: input, shape index: {}]   ;;  %s1305_s1 = inlined_call_operand.vmem [shape: bf16[64,64], index: 1, kind: input, shape index: {}]   ;;  %s1306_s2 = inlined_call_operand.vmem [shape: f32[1,64], index: 2, kind: input, shape index: {}]   ;;  %s1307_s3 = inlined_call_operand.vmem [shape: f32[2,5,64], index: 3, kind: input, shape index: {}]   ;;  %s1308_s4 = inlined_call_operand.vmem [shape: f32[2,5,64], index: 4, kind: output, shape index: {}]  }
   0x1 LB: > { %s953_s16 = sadd.s32 4294967295, %s1139_s15   ;;  %p957_p0 = scmp.ge.s32.totalorder %s1139_s15, 1  ;;  %s1139_s15 = sphi %s1176_s15, %s14_s15  }
   0x2   : > { %p171_p1 = scmp.lt.s32.totalorder %s1139_s15, 3 }
   0x4   : > { %p172_p2 = pnand %p957_p0, %p171_p1 }
   0x5   : > { %p200_p3 = scmp.lt.s32.totalorder (!%p172_p2), %s953_s16, 1  ;;  %v1141_v0 = vmov (!%p172_p2), 0.0   ;;  %vm1142_vm0 = vmmov (!%p172_p2), 0   ;;  %s1143_s21 = smov (!%p172_p2), 64   ;;  %vm230_vm1 = vcmask (!%p172_p2), 130048   ;;  %vm277_vm2 = vcmask (!%p172_p2), 36864  }
   0x6   : > { %175 = sbr.rel (%p172_p2) target bundleno = 2179 (0x883), region = 36  ;;  %1008 = vmatprep.subr.bf16.mxu0 (!%p172_p2), %v1141_v0  ;;  %1010 = vmatprep.mubr.msk.bf16.mxu0 (!%p172_p2), %vm1142_vm0, %v1141_v0  ;;  %s1144_s22 = smov (!%p172_p2), 48   ;;  %vm294_vm3 = vcmask (!%p172_p2), 1041408   ;;  %vm295_vm4 = vcmask (!%p172_p2), 1042432   ;;  %v1145_v15 = vmov (!%p172_p2), 65535   ;;  %vm290_vm5 = vcmask (!%p172_p2), 39936  }
   0x7   : > { %1020 = vmatprep.subr.bf16.mxu1 (!%p172_p2), %v1141_v0  ;;  %1022 = vmatprep.mubr.msk.bf16.mxu1 (!%p172_p2), %vm1142_vm0, %v1141_v0  ;;  %v296_v16 = vsel (!%p172_p2), %vm294_vm3, 4294967295, %v1145_v15  ;;  %s1146_s23 = smov (!%p172_p2), 112   ;;  %s1147_s24 = smov (!%p172_p2), 32   ;;  %v1112_v30 = vld [vmem:[%s1305_s1] sm:$0xff] (!%p172_p2)   ;;  %vm886_vm6 = vcmask (!%p172_p2), 520192  }
   0x8   : > { %v1213_v18 = vsel (!%p172_p2), %vm295_vm4, %v296_v16, 0  ;;  %s1148_s25 = smov (!%p172_p2), 96   ;;  %1021 = vmatpush3.bf16.msra.mxu1 (!%p172_p2), %v1112_v30  ;;  %s1149_s28 = smov (!%p172_p2), 16  }
   0x9   : > { %1032 = vmatprep.subr.bf16.mxu1 (!%p172_p2), %v1141_v0  ;;  %s1150_s29 = smov (!%p172_p2), 80  }
   0xd   : > { %s1310_s16 = smov (!%p200_p3, %s953_s16), 1 }
   0xe   : > { %s1190_s17 = sshll.u32 %s1310_s16, 3 }
   0xf   : > { %s1196_s20 = scalar_lea.vmem %s1304_s0, %s1190_s17  ;;  %s208_s12 = scalar_lea.vmem %s1307_s3, %s1190_s17 }
  0x10   : > { %v223_v1 = vld [vmem:[%s1196_s20] sm:$0x7]  ;;  %v224_v17 = vld [vmem:[%s1196_s20 + $0x4] sm:$0x7]  ;;  %s212_s19 = scalar_lea.vmem %s1308_s4, %s1190_s17 }
  0x11   : > { %v1199_v2 = vcombine.low %v223_v1, %v223_v1  ;;  %v299_v19 = vand.u32 %v1213_v18, %v224_v17  ;;  %v1236_v31 = vcombine.low %v224_v17, %v224_v17 }
  0x13   : > { %228 = vrot.lane.b32.xlu0 %v1199_v2, %s1143_s21  ;;  %396 = vrot.lane.b32.xlu1 %v1199_v2, %s1144_s22 }
  0x85   : > { %v229_v3 = vpop.permute.xlu0 %228  ;;  %v397_v20 = vpop.permute.xlu1 %396 }
  0x86   : > { %v235_v4 = vsel %vm230_vm1, %v229_v3, 0  ;;  %v402_v26 = vsel %vm230_vm1, %v397_v20, 0 }
  0x87   : > { %1009 = vmatpush3.bf16.xpose.msra.mxu0 %v235_v4 }
  0x88   : > { %1014 = vmatprep.subr.bf16.mxu0 %v1141_v0 }
  0x8e   : > { %1011 = vmatmul.mubr.msk.bf16.vlgmr.msra.gmra.mrb[0].mxu0 %vm230_vm1, %v223_v1 }
  0x8f   : > { %1016 = vmatprep.mubr.msk.bf16.mxu0 %vm1142_vm0, %v1141_v0  ;;  %1015 = vmatpush3.bf16.msra.mxu0 %v299_v19  ;;  %v1114_v19 = vld [vmem:[%s1305_s1 + $0x8] sm:$0xff]  }
  0x90   : > { %1026 = vmatprep.subr.bf16.mxu0 %v1141_v0 }
 0x161   : > { %v271_v5 = vpop.f32.mrb[0].mxu0 }
 0x162   : > { %v1012_v6 = vpop.f32.mrb[1].mxu0  ;;  %v278_v7 = vsel %vm277_vm2, %v271_v5, -inf }
 0x163   : > { %279 = vmax.xlane.f32.xlu0 %v278_v7  ;;  %v274_v8 = vpop.f32.mrb[2].mxu0 }
 0x164   : > { %v1013_v9 = vpop.f32.mrb[3].mxu0 }
 0x179   : > { %622 = vrot.lane.b32.xlu0 %v1236_v31, %s1148_s25 }
 0x1f0   : > { %v280_v10 = vpop.xlane.xlu0 %279 }
 0x1f1   : > { %v281_v11 = vsub.f32 %v271_v5, %v280_v10 }
 0x1f3   : > { %v282_v12 = vmul.f32 1.442695, %v281_v11 }
 0x1f4   : > { %v623_v46 = vpop.permute.xlu0 %622 }
 0x1f5   : > { %1117 = vpow2.f32 %v282_v12  ;;  %v628_v47 = vand.u32 %v623_v46, %v1213_v18 }
 0x1ff   : > { %v1118_v13 = vpop.eup %1117 }
 0x200   : > { %v284_v14 = vsel %vm277_vm2, %v1118_v13, 0.0 }
 0x201   : > { %285 = vadd.xlane.f32.xlu1 %v284_v14 }
 0x212   : > { %394 = vrot.lane.b32.xlu1 %v1199_v2, %s1146_s23 }
 0x216   : > { %562 = vrot.lane.b32.xlu1 %v1199_v2, %s1147_s24 }
 0x21a   : > { %560 = vrot.lane.b32.xlu1 %v1199_v2, %s1148_s25 }
 0x28e   : > { %v286_v21 = vpop.xlane.xlu1 %285 }
 0x28f   : > { %1119 = vrcp.f32 %v286_v21 }
 0x292   : > { %v395_v24 = vpop.permute.xlu1 %394 }
 0x296   : > { %v563_v27 = vpop.permute.xlu1 %562 }
 0x297   : > { %v568_v28 = vsel %vm230_vm1, %v563_v27, 0 }
 0x299   : > { %v1120_v22 = vpop.eup %1119 }
 0x29a   : > { %v288_v23 = vmul.f32 %v1120_v22, %v1118_v13  ;;  %v561_v29 = vpop.permute.xlu1 %560 }
 0x29c   : > { %v289_v25 = vpack.c.bf16 %v288_v23, %v288_v23 }
 0x29e   : > { %1017 = vmatmul.mubr.msk.bf16.vlgmr.msra.gmra.mrb[4].mxu0 %vm290_vm5, %v289_v25 }
 0x29f   : > { %1027 = vmatpush3.bf16.xpose.msra.mxu0 %v402_v26  ;;  %1028 = vmatprep.mubr.msk.bf16.mxu0 %vm1142_vm0, %v1141_v0  ;;  %v1115_v26 = vld [vmem:[%s1305_s1 + $0x10] sm:$0xff]  }
 0x2a0   : > { %1044 = vmatprep.subr.bf16.mxu0 %v1141_v0 }
 0x2a6   : > { %1029 = vmatmul.mubr.msk.bf16.vlgmr.msra.gmra.mrb[8].mxu0 %vm230_vm1, %v395_v24 }
 0x2a7   : > { %1045 = vmatpush3.bf16.xpose.msra.mxu0 %v568_v28  ;;  %1046 = vmatprep.mubr.msk.bf16.mxu0 %vm1142_vm0, %v1141_v0 }
 0x2a8   : > { %1050 = vmatprep.subr.bf16.mxu0 %v1141_v0 }
 0x2ae   : > { %1047 = vmatmul.mubr.msk.bf16.vlgmr.msra.gmra.mrb[12].mxu0 %vm230_vm1, %v561_v29 }
 0x2af   : > { %1052 = vmatprep.mubr.msk.bf16.mxu0 %vm1142_vm0, %v1141_v0  ;;  %1051 = vmatpush3.bf16.msra.mxu0 %v628_v47 }
 0x2b0   : > { %1062 = vmatprep.subr.bf16.mxu0 %v1141_v0 }
 0x371   : > { %v335_v32 = vpop.f32.mrb[4].mxu0 }
 0x372   : > { %v341_v33 = vpack.c.bf16 %v335_v32, %v335_v32  ;;  %v1018_v34 = vpop.f32.mrb[5].mxu0 }
 0x373   : > { %v338_v35 = vpop.f32.mrb[6].mxu0 }
 0x374   : > { %v1019_v36 = vpop.f32.mrb[7].mxu0  ;;  %1023 = vmatmul.mubr.msk.bf16.vlgmr.msra.gmra.mrb[0].mxu1 %vm230_vm1, %v341_v33 }
 0x375   : > { %1034 = vmatprep.mubr.msk.bf16.mxu1 %vm1142_vm0, %v1141_v0 }
 0x379   : > { %v438_v37 = vpop.f32.mrb[8].mxu0 }
 0x37a   : > { %v1030_v38 = vpop.f32.mrb[9].mxu0  ;;  %v444_v53 = vsel %vm277_vm2, %v438_v37, -inf }
 0x37b   : > { %v441_v39 = vpop.f32.mrb[10].mxu0 }
 0x37c   : > { %v1031_v40 = vpop.f32.mrb[11].mxu0 }
 0x381   : > { %v604_v41 = vpop.f32.mrb[12].mxu0 }
 0x382   : > { %v1048_v42 = vpop.f32.mrb[13].mxu0  ;;  %v610_v43 = vsel %vm277_vm2, %v604_v41, -inf }
 0x383   : > { %611 = vmax.xlane.f32.xlu1 %v610_v43  ;;  %v607_v44 = vpop.f32.mrb[14].mxu0  ;;  %v214_v43 = vld [vmem:[%s208_s12] sm:$0x1f] }
 0x384   : > { %v1049_v45 = vpop.f32.mrb[15].mxu0  ;;  %v962_v44 = vld [vmem:[%s1306_s2] ss:$0 sm:$0xff] }
 0x385   : > { %v222_v45 = vadd.f32 %v962_v44, %v214_v43 }
 0x410   : > { %v612_v48 = vpop.xlane.xlu1 %611 }
 0x411   : > { %v613_v49 = vsub.f32 %v604_v41, %v612_v48 }
 0x413   : > { %v614_v50 = vmul.f32 1.442695, %v613_v49 }
 0x415   : > { %1121 = vpow2.f32 %v614_v50 }
 0x41f   : > { %v1122_v51 = vpop.eup %1121 }
 0x420   : > { %v616_v52 = vsel %vm277_vm2, %v1122_v51, 0.0 }
 0x421   : > { %617 = vadd.xlane.f32.xlu0 %v616_v52 }
 0x437   : > { %725 = vrot.lane.b32.xlu0 %v1199_v2, %s1149_s28 }
 0x43b   : > { %723 = vrot.lane.b32.xlu0 %v1199_v2, %s1150_s29 }
 0x45a   : > { %445 = vmax.xlane.f32.xlu0 %v444_v53 }
 0x4ae   : > { %v618_v54 = vpop.xlane.xlu0 %617 }
 0x4af   : > { %1123 = vrcp.f32 %v618_v54 }
 0x4b2   : > { %v726_v56 = vpop.permute.xlu0 %725 }
 0x4b3   : > { %v731_v58 = vsel %vm230_vm1, %v726_v56, 0 }
 0x4b6   : > { %v724_v60 = vpop.permute.xlu0 %723 }
 0x4b9   : > { %v1124_v55 = vpop.eup %1123 }
 0x4ba   : > { %v620_v57 = vmul.f32 %v1124_v55, %v1122_v51 }
 0x4bc   : > { %v621_v59 = vpack.c.bf16 %v620_v57, %v620_v57 }
 0x4be   : > { %1053 = vmatmul.mubr.msk.bf16.vlgmr.msra.gmra.mrb[16].mxu0 %vm290_vm5, %v621_v59 }
 0x4bf   : > { %1063 = vmatpush3.bf16.xpose.msra.mxu0 %v731_v58  ;;  %1064 = vmatprep.mubr.msk.bf16.mxu0 %vm1142_vm0, %v1141_v0 }
 0x4c6   : > { %1065 = vmatmul.mubr.msk.bf16.vlgmr.msra.gmra.mrb[20].mxu0 %vm230_vm1, %v724_v60 }
 0x4e7   : > { %v446_v61 = vpop.xlane.xlu0 %445 }
 0x4e8   : > { %v447_v62 = vsub.f32 %v438_v37, %v446_v61  ;;  %v1116_v37 = vld [vmem:[%s1305_s1 + $0x18] sm:$0xff]  }
 0x4ea   : > { %v448_v63 = vmul.f32 1.442695, %v447_v62 }
 0x4ec   : > { %1125 = vpow2.f32 %v448_v63 }
 0x4f6   : > { %v1126_v1 = vpop.eup %1125 }
 0x4f7   : > { %v450_v2 = vsel %vm277_vm2, %v1126_v1, 0.0 }
 0x4f8   : > { %451 = vadd.xlane.f32.xlu1 %v450_v2 }
 0x509   : > { %459 = vrot.lane.b32.xlu1 %v1236_v31, %s1146_s23 }
 0x585   : > { %v452_v3 = vpop.xlane.xlu1 %451 }
 0x586   : > { %1127 = vrcp.f32 %v452_v3 }
 0x589   : > { %v460_v4 = vpop.permute.xlu1 %459 }
 0x58a   : > { %v465_v5 = vand.u32 %v460_v4, %v1213_v18 }
 0x58c   : > { %1033 = vmatpush3.bf16.msra.mxu1 %v465_v5 }
 0x58d   : > { %1038 = vmatprep.subr.bf16.mxu1 %v1141_v0 }
 0x590   : > { %v1128_v6 = vpop.eup %1127 }
 0x591   : > { %v454_v7 = vmul.f32 %v1128_v6, %v1126_v1  ;;  %v664_v8 = vpop.f32.mrb[16].mxu0 }
 0x592   : > { %v1054_v9 = vpop.f32.mrb[17].mxu0  ;;  %v670_v32 = vpack.c.bf16 %v664_v8, %v664_v8 }
 0x593   : > { %v667_v10 = vpop.f32.mrb[18].mxu0  ;;  %v455_v11 = vpack.c.bf16 %v454_v7, %v454_v7 }
 0x594   : > { %v1055_v12 = vpop.f32.mrb[19].mxu0 }
 0x595   : > { %1035 = vmatmul.mubr.msk.bf16.vlgmr.msra.gmra.mrb[4].mxu1 %vm290_vm5, %v455_v11 }
 0x596   : > { %1040 = vmatprep.mubr.msk.bf16.mxu1 %vm1142_vm0, %v1141_v0  ;;  %1039 = vmatpush3.bf16.msra.mxu1 %v1114_v19 }
 0x597   : > { %1056 = vmatprep.subr.bf16.mxu1 %v1141_v0 }
 0x599   : > { %v767_v13 = vpop.f32.mrb[20].mxu0 }
 0x59a   : > { %v1066_v14 = vpop.f32.mrb[21].mxu0  ;;  %v773_v15 = vsel %vm277_vm2, %v767_v13, -inf }
 0x59b   : > { %774 = vmax.xlane.f32.xlu1 %v773_v15  ;;  %v770_v16 = vpop.f32.mrb[22].mxu0 }
 0x59c   : > { %v1067_v17 = vpop.f32.mrb[23].mxu0 }
 0x628   : > { %v775_v20 = vpop.xlane.xlu1 %774 }
 0x629   : > { %v776_v21 = vsub.f32 %v767_v13, %v775_v20 }
 0x62b   : > { %v777_v22 = vmul.f32 1.442695, %v776_v21 }
 0x62d   : > { %1129 = vpow2.f32 %v777_v22 }
 0x637   : > { %v1130_v23 = vpop.eup %1129 }
 0x638   : > { %v779_v24 = vsel %vm277_vm2, %v1130_v23, 0.0 }
 0x639   : > { %780 = vadd.xlane.f32.xlu0 %v779_v24 }
 0x64f   : > { %785 = vrot.lane.b32.xlu0 %v1236_v31, %s1150_s29 }
 0x668   : > { %v501_v25 = vpop.f32.mrb[4].mxu1 }
 0x669   : > { %v507_v27 = vpack.c.bf16 %v501_v25, %v501_v25  ;;  %v1036_v28 = vpop.f32.mrb[5].mxu1 }
 0x66a   : > { %v504_v29 = vpop.f32.mrb[6].mxu1 }
 0x66b   : > { %v1037_v30 = vpop.f32.mrb[7].mxu1  ;;  %1041 = vmatmul.mubr.msk.bf16.vlgmr.msra.gmra.mrb[0].mxu1 %vm230_vm1, %v507_v27 }
 0x66c   : > { %1057 = vmatpush3.bf16.msra.mxu1 %v1115_v26  ;;  %1058 = vmatprep.mubr.msk.bf16.mxu1 %vm1142_vm0, %v1141_v0 }
 0x66d   : > { %1068 = vmatprep.subr.bf16.mxu1 %v1141_v0 }
 0x677   : > { %1059 = vmatmul.mubr.msk.bf16.vlgmr.msra.gmra.mrb[0].mxu1 %vm230_vm1, %v670_v32 }
 0x678   : > { %1070 = vmatprep.mubr.msk.bf16.mxu1 %vm1142_vm0, %v1141_v0 }
 0x6c6   : > { %v781_v31 = vpop.xlane.xlu0 %780 }
 0x6c7   : > { %1131 = vrcp.f32 %v781_v31 }
 0x6ca   : > { %v786_v33 = vpop.permute.xlu0 %785 }
 0x6cb   : > { %v791_v34 = vand.u32 %v786_v33, %v1213_v18 }
 0x6cd   : > { %1069 = vmatpush3.bf16.msra.mxu1 %v791_v34 }
 0x6ce   : > { %1074 = vmatprep.subr.bf16.mxu1 %v1141_v0 }
 0x6d1   : > { %v1132_v35 = vpop.eup %1131 }
 0x6d2   : > { %v783_v36 = vmul.f32 %v1132_v35, %v1130_v23 }
 0x6d4   : > { %v784_v38 = vpack.c.bf16 %v783_v36, %v783_v36 }
 0x6d6   : > { %1071 = vmatmul.mubr.msk.bf16.vlgmr.msra.gmra.mrb[8].mxu1 %vm290_vm5, %v784_v38 }
 0x6d7   : > { %1075 = vmatpush3.bf16.msra.mxu1 %v1116_v37  ;;  %1076 = vmatprep.mubr.msk.bf16.mxu1 %vm1142_vm0, %v1141_v0 }
 0x7a9   : > { %v827_v39 = vpop.f32.mrb[8].mxu1 }
 0x7aa   : > { %v833_v18 = vpack.c.bf16 %v827_v39, %v827_v39  ;;  %v1072_v40 = vpop.f32.mrb[9].mxu1 }
 0x7ab   : > { %v830_v41 = vpop.f32.mrb[10].mxu1 }
 0x7ac   : > { %v1073_v42 = vpop.f32.mrb[11].mxu1  ;;  %1077 = vmatmul.mubr.msk.bf16.vlgmr.msra.gmra.mrb[0].mxu1 %vm230_vm1, %v833_v18 }
 0x87f   : > { %v879_v0 = vpop.f32.mrb[0].mxu1 }
 0x880   : > { %v1080_v46 = vadd.f32 %v879_v0, %v222_v45  ;;  %v1078_v47 = vpop.f32.mrb[1].mxu1 }
 0x881   : > { %v882_v48 = vpop.f32.mrb[2].mxu1 }
 0x882   : > { %887 = vst.msk [vmem:[%s212_s19] sm:$0x1f] %vm886_vm6, %v1080_v46  ;;  %v1079_v49 = vpop.f32.mrb[3].mxu1 }
 0x883 PF: > { %s14_s15 = sadd.s32 1, %s1139_s15  }
 0x884   : > { %p11_p4 = scmp.ge.s32.totalorder %s14_s15, 4  }
 0x886   :  { %13 = sbr.rel (!%p11_p4) target bundleno = 1 (0x1), region = 69 }

// kernel: _lambda_.14
= control target key start
LH: loop header
LB: loop body
LE: loop exit
PB: predicated region body
PF: predicated region fallthrough
CT: control target
= control target key end

     0   :  { %vm27_vm0 = vcmask 523264   ;;  %vm31_vm1 = vcmask 517120   ;;  %v262_v15 = vmov 0.0   ;;  %vm263_vm2 = vmmov 0   ;;  %s330_s0 = inlined_call_operand.vmem [shape: f32[10,64], index: 0, kind: input, shape index: {}]   ;;  %s331_s3 = inlined_call_operand.vmem [shape: bf16[64,128], index: 3, kind: input, shape index: {}]   ;;  %s332_s1 = inlined_call_operand.vmem [shape: f32[1,64], index: 1, kind: input, shape index: {}]   ;;  %s333_s2 = inlined_call_operand.vmem [shape: f32[1,64], index: 2, kind: input, shape index: {}]   ;;  %s334_s4 = inlined_call_operand.vmem [shape: f32[1,128], index: 4, kind: input, shape index: {}]   ;;  %s335_s5 = inlined_call_operand.vmem [shape: bf16[10,128], index: 5, kind: output, shape index: {}]  }
   0x1   :  { %v25_v0 = vld [vmem:[%s330_s0] sm:$0xff]  ;;  %v26_v1 = vld [vmem:[%s330_s0 + $0x8] sm:$0x3]  ;;  %231 = vmatprep.subr.bf16.mxu0 %v262_v15  ;;  %v247_v17 = vld [vmem:[%s331_s3 + $0x10] sm:$0xff]   ;;  %239 = vmatprep.mubr.msk.bf16.mxu0 %vm263_vm2, %v262_v15  ;;  %vm82_vm3 = vcmask 519168   ;;  %vm84_vm4 = vcmask 516096  }
   0x2   :  { %v28_v2 = vsel %vm27_vm0, %v25_v0, 0.0  ;;  %v32_v3 = vsel %vm31_vm1, %v26_v1, 0.0  ;;  %v245_v14 = vld [vmem:[%s331_s3] sm:$0xff]   ;;  %v246_v16 = vld [vmem:[%s331_s3 + $0x8] sm:$0xff]   ;;  %v248_v18 = vld [vmem:[%s331_s3 + $0x18] sm:$0xff]  }
   0x3   :  { %29 = vadd.xlane.f32.xlu0 %v28_v2  ;;  %232 = vmatpush3.bf16.msra.mxu0 %v245_v14  ;;  %v207_v26 = vld [vmem:[%s332_s1] ss:$0 sm:$0xff] }
   0x4   :  { %233 = vmatprep.subr.bf16.mxu0 %v262_v15  ;;  %v208_v28 = vld [vmem:[%s333_s2] ss:$0 sm:$0xff] }
   0x5   :  { %v211_v38 = vld [vmem:[%s334_s4] ss:$0 sm:$0xff] }
   0x7   :  { %33 = vadd.xlane.f32.xlu0 %v32_v3  ;;  %234 = vmatpush3.bf16.msra.mxu0 %v246_v16 }
   0x8   :  { %235 = vmatprep.subr.bf16.mxu0 %v262_v15 }
   0xb   :  { %236 = vmatpush3.bf16.msra.mxu0 %v247_v17 }
   0xc   :  { %237 = vmatprep.subr.bf16.mxu0 %v262_v15 }
   0xf   :  { %238 = vmatpush3.bf16.msra.mxu0 %v248_v18 }
  0x90   :  { %v30_v4 = vpop.xlane.xlu0 %29 }
  0x91   :  { %v36_v5 = vmul.f32 0.015625, %v30_v4 }
  0x93   :  { %v38_v6 = vsub.f32 %v25_v0, %v36_v5 }
  0x94   :  { %v34_v7 = vpop.xlane.xlu0 %33 }
  0x95   :  { %v37_v8 = vmul.f32 0.015625, %v34_v7  ;;  %v40_v9 = vmul.f32 %v38_v6, %v38_v6 }
  0x97   :  { %v39_v10 = vsub.f32 %v26_v1, %v37_v8  ;;  %v42_v11 = vsel %vm27_vm0, %v40_v9, 0.0 }
  0x98   :  { %43 = vadd.xlane.f32.xlu1 %v42_v11 }
  0x99   :  { %v41_v12 = vmul.f32 %v39_v10, %v39_v10 }
  0x9b   :  { %v45_v13 = vsel %vm31_vm1, %v41_v12, 0.0 }
  0x9c   :  { %46 = vadd.xlane.f32.xlu1 %v45_v13 }
 0x125   :  { %v44_v19 = vpop.xlane.xlu1 %43 }
 0x126   :  { %v48_v20 = vmul.f32 0.015625, %v44_v19 }
 0x128   :  { %v50_v21 = vadd.f32 1e-05, %v48_v20 }
 0x129   :  { %v47_v22 = vpop.xlane.xlu1 %46 }
 0x12a   :  { %250 = vrsqrt.f32 %v50_v21  ;;  %v49_v23 = vmul.f32 0.015625, %v47_v22 }
 0x12c   :  { %v51_v24 = vadd.f32 1e-05, %v49_v23 }
 0x12e   :  { %252 = vrsqrt.f32 %v51_v24 }
 0x134   :  { %v251_v25 = vpop.eup %250 }
 0x135   :  { %v54_v27 = vmul.f32 %v251_v25, %v38_v6 }
 0x137   :  { %v63_v29 = vmul.f32 %v207_v26, %v54_v27 }
 0x138   :  { %v253_v30 = vpop.eup %252 }
 0x139   :  { %v72_v31 = vadd.f32 %v208_v28, %v63_v29  ;;  %v55_v32 = vmul.f32 %v253_v30, %v39_v10 }
 0x13b   :  { %v222_v33 = vpack.c.bf16 %v72_v31, %v72_v31  ;;  %v64_v34 = vmul.f32 %v207_v26, %v55_v32 }
 0x13d   :  { %83 = vst.msk [vmem:[#allocation2] sm:$0xf] %vm82_vm3, %v222_v33  ;;  %v73_v35 = vadd.f32 %v208_v28, %v64_v34 }
 0x13f   :  { %v223_v36 = vpack.c.bf16 %v73_v35, %v73_v35 }
 0x141   :  { %85 = vst.msk [vmem:[#allocation2 + $0x4] sm:$0x1] %vm84_vm4, %v223_v36 }
 0x148   :  { %v249_v37 = vld [vmem:[#allocation2] sm:$0x1f]  }
 0x149   :  { %240 = vmatmul.mubr.msk.bf16.vlgmr.msra.gmra.mrb[0].mxu0 %vm27_vm0, %v249_v37 }
 0x21c   :  { %v170_v39 = vpop.f32.mrb[0].mxu0 }
 0x21d   :  { %v171_v40 = vadd.f32 %v211_v38, %v170_v39  ;;  %v241_v41 = vpop.f32.mrb[1].mxu0 }
 0x21e   :  { %v173_v42 = vpop.f32.mrb[2].mxu0 }
 0x21f   :  { %v218_v43 = vmul.f32 -1.702, %v171_v40  ;;  %v174_v44 = vadd.f32 %v211_v38, %v173_v42  ;;  %v242_v45 = vpop.f32.mrb[3].mxu0 }
 0x221   :  { %v181_v46 = vmul.f32 1.442695, %v218_v43  ;;  %v219_v47 = vmul.f32 -1.702, %v174_v44 }
 0x223   :  { %254 = vpow2.f32 %v181_v46  ;;  %v183_v48 = vmul.f32 1.442695, %v219_v47 }
 0x225   :  { %256 = vpow2.f32 %v183_v48 }
 0x22d   :  { %v255_v49 = vpop.eup %254 }
 0x22e   :  { %v185_v50 = vadd.f32 1.0, %v255_v49 }
 0x22f   :  { %v257_v51 = vpop.eup %256 }
 0x230   :  { %258 = vrcp.f32 %v185_v50  ;;  %v186_v52 = vadd.f32 1.0, %v257_v51 }
 0x232   :  { %260 = vrcp.f32 %v186_v52 }
 0x23a   :  { %v259_v53 = vpop.eup %258 }
 0x23b   :  { %v191_v54 = vmul.f32 %v259_v53, %v171_v40 }
 0x23c   :  { %v261_v55 = vpop.eup %260 }
 0x23d   :  { %v224_v56 = vpack.c.bf16 %v191_v54, %v191_v54  ;;  %v192_v57 = vmul.f32 %v261_v55, %v174_v44 }
 0x23f   :  { %201 = vst [vmem:[%s335_s5] sm:$0xf] %v224_v56  ;;  %v225_v58 = vpack.c.bf16 %v192_v57, %v192_v57 }
 0x241   :  { %202 = vst [vmem:[%s335_s5 + $0x4] sm:$0x1] %v225_v58 }

// kernel: _lambda_.15
= control target key start
LH: loop header
LB: loop body
LE: loop exit
PB: predicated region body
PF: predicated region fallthrough
CT: control target
= control target key end

     0   :  { %vm22_vm0 = vcmask 523264   ;;  %v221_v0 = vmov 0.0   ;;  %vm222_vm1 = vmmov 0   ;;  %vm24_vm2 = vcmask 517120   ;;  %s296_s1 = inlined_call_operand.vmem [shape: bf16[128,64], index: 1, kind: input, shape index: {}]   ;;  %s297_s0 = inlined_call_operand.vmem [shape: bf16[10,128], index: 0, kind: input, shape index: {}]   ;;  %s298_s2 = inlined_call_operand.vmem [shape: f32[1,64], index: 2, kind: input, shape index: {}]   ;;  %s299_s3 = inlined_call_operand.vmem [shape: f32[10,64], index: 3, kind: input, shape index: {}]   ;;  %s300_s4 = inlined_call_operand.vmem [shape: f32[10,64], index: 4, kind: output, shape index: {}]  }
   0x1   :  { %190 = vmatprep.subr.bf16.mxu0 %v221_v0  ;;  %v212_v1 = vld [vmem:[%s296_s1] sm:$0xff]   ;;  %206 = vmatprep.mubr.msk.bf16.mxu0 %vm222_vm1, %v221_v0  ;;  %23 = vst.msk [vmem:[#allocation2] sm:$0xff] %vm22_vm0, %v221_v0  ;;  %v213_v2 = vld [vmem:[%s296_s1 + $0x8] sm:$0xff]   ;;  %v214_v3 = vld [vmem:[%s296_s1 + $0x10] sm:$0xff]  }
   0x2   :  { %191 = vmatpush3.bf16.msra.mxu0 %v212_v1  ;;  %v215_v4 = vld [vmem:[%s296_s1 + $0x18] sm:$0xff]   ;;  %v216_v5 = vld [vmem:[%s296_s1 + $0x20] sm:$0xff]   ;;  %v217_v6 = vld [vmem:[%s296_s1 + $0x28] sm:$0xff]   ;;  %25 = vst.msk [vmem:[#allocation2 + $0x8] sm:$0x3] %vm24_vm2, %v221_v0 }
   0x3   :  { %192 = vmatprep.subr.bf16.mxu0 %v221_v0  ;;  %v218_v7 = vld [vmem:[%s296_s1 + $0x30] sm:$0xff]   ;;  %v219_v8 = vld [vmem:[%s296_s1 + $0x38] sm:$0xff]   ;;  %v220_v9 = vld [vmem:[%s297_s0] sm:$0x1f]  }
   0x4   :  { %v180_v18 = vld [vmem:[%s298_s2] ss:$0 sm:$0xff]  ;;  %v162_v23 = vld [vmem:[%s299_s3 + $0x8] sm:$0x3] }
   0x5   :  { %v161_v20 = vld [vmem:[%s299_s3] sm:$0xff] }
   0x6   :  { %193 = vmatpush3.bf16.msra.mxu0 %v213_v2 }
   0x7   :  { %194 = vmatprep.subr.bf16.mxu0 %v221_v0 }
   0x8   :  { %v26_v10 = vld [vmem:[#allocation2] sm:$0xff] }
   0x9   :  { %v27_v12 = vld [vmem:[#allocation2 + $0x8] sm:$0x3] }
   0xa   :  { %195 = vmatpush3.bf16.msra.mxu0 %v214_v3 }
   0xb   :  { %196 = vmatprep.subr.bf16.mxu0 %v221_v0 }
   0xe   :  { %197 = vmatpush3.bf16.msra.mxu0 %v215_v4 }
   0xf   :  { %198 = vmatprep.subr.bf16.mxu0 %v221_v0 }
  0x12   :  { %199 = vmatpush3.bf16.msra.mxu0 %v216_v5 }
  0x13   :  { %200 = vmatprep.subr.bf16.mxu0 %v221_v0 }
  0x16   :  { %201 = vmatpush3.bf16.msra.mxu0 %v217_v6 }
  0x17   :  { %202 = vmatprep.subr.bf16.mxu0 %v221_v0 }
  0x1a   :  { %203 = vmatpush3.bf16.msra.mxu0 %v218_v7 }
  0x1b   :  { %204 = vmatprep.subr.bf16.mxu0 %v221_v0 }
  0x1e   :  { %205 = vmatpush3.bf16.msra.mxu0 %v219_v8 }
  0x21   :  { %207 = vmatmul.mubr.bf16.vlgmr.msra.gmra.mrb[0].mxu0 %v220_v9 }
  0xf4   :  { %v134_v11 = vpop.f32.mrb[0].mxu0 }
  0xf5   :  { %v141_v13 = vadd.f32 %v134_v11, %v26_v10  ;;  %v208_v14 = vpop.f32.mrb[1].mxu0 }
  0xf6   :  { %v137_v15 = vpop.f32.mrb[2].mxu0 }
  0xf7   :  { %144 = vst.msk [vmem:[#allocation2] sm:$0xff] %vm22_vm0, %v141_v13  ;;  %v142_v16 = vadd.f32 %v137_v15, %v27_v12  ;;  %v209_v17 = vpop.f32.mrb[3].mxu0 }
  0xf9   :  { %146 = vst.msk [vmem:[#allocation2 + $0x8] sm:$0x3] %vm24_vm2, %v142_v16 }
  0xfe   :  { %v150_v19 = vld [vmem:[#allocation2] sm:$0xff] }
  0xff   :  { %v159_v21 = vadd.f32 %v180_v18, %v150_v19 }
 0x100   :  { %v151_v22 = vld [vmem:[#allocation2 + $0x8] sm:$0x3] }
 0x101   :  { %v163_v24 = vadd.f32 %v161_v20, %v159_v21  ;;  %v160_v25 = vadd.f32 %v180_v18, %v151_v22 }
 0x103   :  { %165 = vst.msk [vmem:[%s300_s4] sm:$0xff] %vm22_vm0, %v163_v24  ;;  %v164_v26 = vadd.f32 %v162_v23, %v160_v25 }
 0x105   :  { %166 = vst.msk [vmem:[%s300_s4 + $0x8] sm:$0x3] %vm24_vm2, %v164_v26 }

</bundles_post_ra>
